<compile_context>
chip_gen: v6e
topology: v6e:2x2x1
jax: 0.10.0
libtpu: 0.0.40
codegen_flags: <defaults>
</compile_context>

<pallas_src>
import functools

import jax
import jax.numpy as jnp
from jax.experimental import pallas as pl
from jax.experimental.pallas import tpu as pltpu


# ----------------------------------------------------------------------------
# Fused kernel: Bt batch elements per grid step.
# ----------------------------------------------------------------------------
def _fused_corner_kernel(x_ref, *rest, H, W, Cin, F, threshold,
                         use_external_masks):
    if use_external_masks:
        masks_ref, *rest = rest
    else:
        masks_ref = None
    (bb_w_ref, bb_b_ref, pt_w_ref, pt_b_ref, cn_w_ref, cn_b_ref,
     pts_ref, conn_ref) = rest

    Bt = x_ref.shape[0]
    HW = H * W
    M = Bt * HW

    def conv3x3(x_hw, w_ref, b_ref):
        """3x3 same-padding conv as 3 accumulated K=3*C MXU matmuls.

        x_hw: (Bt, H, W, C) bf16.  w_ref: (3, 3*C, Cout) bf16, leading axis
        indexed by dx, (dy, cin) flattened.  Only dx=0/2 need a 1-column
        sublane-direction shift; dy shifts are free major-axis slices; the
        zero border is built from thin in-register strips (no full zero-fill).
        """
        C = x_hw.shape[-1]
        zrow = jnp.zeros((Bt, 1, W, C), x_hw.dtype)
        xh = jnp.concatenate([zrow, x_hw, zrow], axis=1)        # (Bt,H+2,W,C)
        zcol = jnp.zeros((Bt, H + 2, 1, C), x_hw.dtype)
        acc = None
        for dx in range(3):
            if dx == 0:      # shift right, zero-fill left column
                xs = jnp.concatenate([zcol, xh[:, :, :W - 1, :]], axis=2)
            elif dx == 1:    # center tap: no W-axis data movement at all
                xs = xh
            else:            # shift left, zero-fill right column
                xs = jnp.concatenate([xh[:, :, 1:, :], zcol], axis=2)
            cols = [xs[:, dy:dy + H, :, :] for dy in range(3)]  # free slices
            im2col = jnp.concatenate(cols, axis=-1).reshape(M, 3 * C)
            part = jnp.dot(im2col, w_ref[dx],
                           preferred_element_type=jnp.float32)
            acc = part if acc is None else acc + part
        return acc + b_ref[...]                                  # (M, Cout) f32

    # ---- backbone stand-in: 3x3 conv Cin -> F, ReLU (bf16 in, f32 acc) ------
    enc = jnp.maximum(conv3x3(x_ref[...], bb_w_ref, bb_b_ref), 0.0)   # (M, F)
    enc_bf = enc.astype(jnp.bfloat16)                    # reused below (bf16)

    # ---- points head: 3x3 conv F -> 2, lane-dense sigmoid -------------------
    logits = conv3x3(enc_bf.reshape(Bt, H, W, F), pt_w_ref, pt_b_ref)  # (M, 2)
    logits_t = logits.reshape(Bt, HW, 2).transpose(0, 2, 1)    # (Bt, 2, HW)
    pts_t = jax.nn.sigmoid(logits_t)        # sigmoid on the lane-dense layout
    pts_ref[...] = pts_t

    # ---- corner masks -------------------------------------------------------
    if use_external_masks:
        m = (masks_ref[...] > 0.0).astype(jnp.float32)           # (Bt, 2, HW)
    else:
        # TODO(synk): ConnectedComponents per-instance labelling is sequential
        # and data dependent (no clean Pallas/TPU equivalent); the global
        # thresholded heatmap is used as the corner mask instead.
        m = (pts_t > threshold).astype(jnp.float32)              # (Bt, 2, HW)

    # ---- VectorsFromMask: masked mean via MXU contraction over HW -----------
    s = jnp.einsum("bmh,bhf->bmf", m.astype(jnp.bfloat16),
                   enc_bf.reshape(Bt, HW, F),
                   preferred_element_type=jnp.float32)           # (Bt, 2, F)
    cnt = jnp.sum(m, axis=-1, keepdims=True)                     # (Bt, 2, 1)
    vec = s / jnp.maximum(cnt, 1.0)                # row 0 = lt, row 1 = rb

    # ---- ConnectNet: sigmoid(concat(lt, rb) @ W + b) as a VPU dot over F ----
    contrib = jnp.sum(vec * cn_w_ref[...][None, :, :], axis=-1)   # (Bt, 2)
    y = contrib[:, 0:1] + contrib[:, 1:2] + cn_b_ref[...]         # (Bt, 1)
    conn_ref[...] = jax.nn.sigmoid(y).reshape(Bt, 1, 1)


# ----------------------------------------------------------------------------
# VMEM budgeting
# ----------------------------------------------------------------------------
def _vmem_limit_bytes():
    # Do NOT request the full physical VMEM (v7x has 64 MiB/TC); leave room
    # for double-buffered blocks and compiler internal scratch.
    phys = 64 << 20
    try:
        phys = pltpu.get_tpu_info().vmem_capacity_bytes
    except Exception:
        pass
    return int(min(48 << 20, phys * 3 // 4))


def _pick_batch_tile(B, H, W, Cin, F, budget_bytes):
    # Images per grid step: as many as the VMEM budget allows, but keep >= 2
    # grid steps (and B % Bt == 0) so both v7x TensorCores get work.
    HW = H * W
    per_img = (
        HW * Cin * 2 * 2                    # input block (bf16), double-buffered
        + (H + 2) * W * (Cin + F) * 2       # H-padded bf16 working copies
        + HW * 3 * max(Cin, F) * 2 * 2      # im2col staging (bf16), with slack
        + HW * F * (4 + 2)                  # conv-1 f32 accumulator + bf16 enc
        + HW * 2 * 4 * 3                    # logits / heatmap / mask
        + 2 * HW * 4 * 2                    # points output block, double-buffered
    )
    cap = max(1, budget_bytes // max(per_img, 1))
    if B >= 2:
        cap = min(cap, B // 2)
    bt = 1
    for d in range(1, min(cap, B) + 1):
        if B % d == 0:
            bt = d
    return bt


# ----------------------------------------------------------------------------
# Parameters & forward
# ----------------------------------------------------------------------------
def init_params(key, cin, features_size):
    k = jax.random.split(key, 6)
    F = features_size
    return dict(
        bb_w=jax.random.normal(k[0], (3, 3, cin, F), jnp.float32) * 0.1,   # HWIO
        bb_b=jax.random.normal(k[1], (1, F), jnp.float32) * 0.01,
        pt_w=jax.random.normal(k[2], (3, 3, F, 2), jnp.float32) * 0.1,     # HWIO
        pt_b=jax.random.normal(k[3], (1, 2), jnp.float32) * 0.01,
        cn_w=jax.random.normal(k[4], (2 * F, 1), jnp.float32) * 0.1,
        cn_b=jax.random.normal(k[5], (1, 1), jnp.float32) * 0.01,
    )


def corner_net_forward(params, x_nchw, left_top_points=None,
                       right_bottom_points=None):
    threshold = 0.5
    B, Cin, H, W = x_nchw.shape
    F = params["bb_w"].shape[-1]
    HW = H * W

    vmem_limit = _vmem_limit_bytes()
    Bt = _pick_batch_tile(B, H, W, Cin, F, budget_bytes=vmem_limit // 2)

    # NCHW -> NHWC, bf16 input (halves HBM read; accumulation stays f32).
    x = jnp.transpose(x_nchw, (0, 2, 3, 1)).astype(jnp.bfloat16)

    # Per-dx weight slabs (dx, (dy, cin), cout) so the kernel runs 3
    # accumulated K=3*C matmuls per conv.  Weights are HWIO; tiny, done once.
    bb_w = (jnp.transpose(params["bb_w"], (1, 0, 2, 3))
            .reshape(3, 3 * Cin, F).astype(jnp.bfloat16))
    bb_b = params["bb_b"].astype(jnp.float32)                   # (1, F)
    pt_w = (jnp.transpose(params["pt_w"], (1, 0, 2, 3))
            .reshape(3, 3 * F, 2).astype(jnp.bfloat16))
    pt_b = params["pt_b"].astype(jnp.float32)                   # (1, 2)
    cn_w = params["cn_w"].reshape(2, F).astype(jnp.float32)     # row0=lt, row1=rb
    cn_b = params["cn_b"].astype(jnp.float32)                   # (1, 1)

    use_external = (left_top_points is not None
                    and right_bottom_points is not None)

    inputs = [x]
    in_specs = [pl.BlockSpec((Bt, H, W, Cin), lambda bi: (bi, 0, 0, 0))]
    if use_external:
        # External corner masks accepted in NCHW (B, 1, H, W); nonzero == mask.
        lt = left_top_points.reshape(B, 1, HW).astype(jnp.float32)
        rb = right_bottom_points.reshape(B, 1, HW).astype(jnp.float32)
        masks = jnp.concatenate([lt, rb], axis=1)               # (B, 2, HW)
        inputs.append(masks)
        in_specs.append(pl.BlockSpec((Bt, 2, HW), lambda bi: (bi, 0, 0)))
    inputs += [bb_w, bb_b, pt_w, pt_b, cn_w, cn_b]
    # NOTE: constant-index weight blocks still get two pipeline buffers each;
    # at realistic F consider pipeline_mode=pl.Buffered(1) for v7x headroom.
    in_specs += [
        pl.BlockSpec((3, 3 * Cin, F), lambda bi: (0, 0, 0)),
        pl.BlockSpec((1, F), lambda bi: (0, 0)),
        pl.BlockSpec((3, 3 * F, 2), lambda bi: (0, 0, 0)),
        pl.BlockSpec((1, 2), lambda bi: (0, 0)),
        pl.BlockSpec((2, F), lambda bi: (0, 0)),
        pl.BlockSpec((1, 1), lambda bi: (0, 0)),
    ]

    kernel = functools.partial(
        _fused_corner_kernel, H=H, W=W, Cin=Cin, F=F,
        threshold=threshold, use_external_masks=use_external)

    # TODO(synk): for large H, W add a grid axis over row blocks with a 1-row
    # halo so the im2col intermediate stays bounded (mandatory on v7x 64 MiB).
    pts, conn = pl.pallas_call(
        kernel,
        out_shape=(jax.ShapeDtypeStruct((B, 2, HW), jnp.float32),
                   jax.ShapeDtypeStruct((B, 1, 1), jnp.float32)),
        grid=(B // Bt,),
        in_specs=in_specs,
        out_specs=(pl.BlockSpec((Bt, 2, HW), lambda bi: (bi, 0, 0)),
                   pl.BlockSpec((Bt, 1, 1), lambda bi: (bi, 0, 0))),
        compiler_params=pltpu.CompilerParams(
            dimension_semantics=("parallel",),
            vmem_limit_bytes=vmem_limit),
    )(*inputs)

    connections = conn.reshape(B, 1)
    points_nchw = pts.reshape(B, 2, H, W)   # (B, 2, H*W) is already NCHW order
    return connections, points_nchw


if __name__ == "__main__":
    B, Cin, H, W = 2, 4, 16, 16
    FEATURES = 32
    key = jax.random.PRNGKey(0)
    kx, kp = jax.random.split(key)
    x = jax.random.normal(kx, (B, Cin, H, W), jnp.float32)
    params = init_params(kp, Cin, FEATURES)

    connections, points = jax.jit(corner_net_forward)(params, x)
    jax.block_until_ready((connections, points))

    assert connections.shape == (B, 1)
    assert points.shape == (B, 2, H, W)
    assert bool(jnp.all(jnp.isfinite(connections)))
    assert bool(jnp.all((points >= 0.0) & (points <= 1.0)))
    print("KERNEL_OK")
</pallas_src>

<mosaic_0001>
module attributes {stable_mosaic.version = 11 : i64} {
  func.func @_fused_corner_kernel(%arg0: i32, %arg1: memref<1x16x16x4xbf16, #tpu.memory_space<vmem>>, %arg2: memref<3x12x32xbf16, #tpu.memory_space<vmem>>, %arg3: memref<1x32xf32, #tpu.memory_space<vmem>>, %arg4: memref<3x96x2xbf16, #tpu.memory_space<vmem>>, %arg5: memref<1x2xf32, #tpu.memory_space<vmem>>, %arg6: memref<2x32xf32, #tpu.memory_space<vmem>>, %arg7: memref<1x1xf32, #tpu.memory_space<vmem>>, %arg8: memref<1x2x256xf32, #tpu.memory_space<vmem>>, %arg9: memref<1x1x1xf32, #tpu.memory_space<vmem>>) attributes {dimension_semantics = [#tpu.dimension_semantics<parallel>], iteration_bounds = array<i64: 2>, scalar_prefetch = 0 : i64, scratch_operands = 0 : i64, tpu.core_type = #tpu.core_type<tc>, window_params = [{transform_indices = @transform_0, window_bounds = array<i64: 1, 16, 16, 4>}, {pipeline_mode = #tpu.pipeline_mode<synchronous>, transform_indices = @transform_1, window_bounds = array<i64: 3, 12, 32>}, {pipeline_mode = #tpu.pipeline_mode<synchronous>, transform_indices = @transform_2, window_bounds = array<i64: 1, 32>}, {pipeline_mode = #tpu.pipeline_mode<synchronous>, transform_indices = @transform_3, window_bounds = array<i64: 3, 96, 2>}, {pipeline_mode = #tpu.pipeline_mode<synchronous>, transform_indices = @transform_4, window_bounds = array<i64: 1, 2>}, {pipeline_mode = #tpu.pipeline_mode<synchronous>, transform_indices = @transform_5, window_bounds = array<i64: 2, 32>}, {pipeline_mode = #tpu.pipeline_mode<synchronous>, transform_indices = @transform_6, window_bounds = array<i64: 1, 1>}, {transform_indices = @transform_7, window_bounds = array<i64: 1, 2, 256>}, {transform_indices = @transform_8, window_bounds = array<i64: 1, 1, 1>}]} {
    %c0 = arith.constant 0 : index
    %c0_0 = arith.constant 0 : index
    %c0_1 = arith.constant 0 : index
    %c0_2 = arith.constant 0 : index
    %0 = vector.load %arg1[%c0, %c0_0, %c0_1, %c0_2] : memref<1x16x16x4xbf16, #tpu.memory_space<vmem>>, vector<1x16x16x4xbf16>
    %cst = arith.constant 0.000000e+00 : bf16
    %1 = vector.broadcast %cst : bf16 to vector<1x1x16x4xbf16>
    %2 = tpu.concatenate %1, %0, %1 in 1 : vector<1x1x16x4xbf16>, vector<1x16x16x4xbf16>, vector<1x1x16x4xbf16> -> vector<1x18x16x4xbf16>
    %cst_3 = arith.constant 0.000000e+00 : bf16
    %3 = vector.broadcast %cst_3 : bf16 to vector<1x18x1x4xbf16>
    %4 = vector.extract_strided_slice %2 {offsets = [0, 0, 0, 0], sizes = [1, 18, 15, 4], strides = [1, 1, 1, 1]} : vector<1x18x16x4xbf16> to vector<1x18x15x4xbf16>
    %5 = tpu.concatenate %3, %4 in 2 : vector<1x18x1x4xbf16>, vector<1x18x15x4xbf16> -> vector<1x18x16x4xbf16>
    %6 = vector.extract_strided_slice %5 {offsets = [0, 0, 0, 0], sizes = [1, 16, 16, 4], strides = [1, 1, 1, 1]} : vector<1x18x16x4xbf16> to vector<1x16x16x4xbf16>
    %7 = vector.extract_strided_slice %5 {offsets = [0, 1, 0, 0], sizes = [1, 16, 16, 4], strides = [1, 1, 1, 1]} : vector<1x18x16x4xbf16> to vector<1x16x16x4xbf16>
    %8 = vector.extract_strided_slice %5 {offsets = [0, 2, 0, 0], sizes = [1, 16, 16, 4], strides = [1, 1, 1, 1]} : vector<1x18x16x4xbf16> to vector<1x16x16x4xbf16>
    %9 = tpu.concatenate %6, %7, %8 in 3 : vector<1x16x16x4xbf16>, vector<1x16x16x4xbf16>, vector<1x16x16x4xbf16> -> vector<1x16x16x12xbf16>
    %10 = vector.shape_cast %9 : vector<1x16x16x12xbf16> to vector<256x12xbf16>
    %c0_4 = arith.constant 0 : index
    %c0_5 = arith.constant 0 : index
    %c0_6 = arith.constant 0 : index
    %11 = vector.load %arg2[%c0_4, %c0_5, %c0_6] : memref<3x12x32xbf16, #tpu.memory_space<vmem>>, vector<1x12x32xbf16>
    %12 = vector.shape_cast %11 : vector<1x12x32xbf16> to vector<12x32xbf16>
    %cst_7 = arith.constant dense<0.000000e+00> : vector<256x32xf32>
    %13 = tpu.matmul %10, %12, %cst_7 {dimension_numbers = #tpu.dot_dimension_numbers<[1], [0], [0], [1], [0, 0, 1, 1], [], []>} : vector<256x12xbf16>, vector<12x32xbf16>, vector<256x32xf32> -> vector<256x32xf32>
    %14 = vector.extract_strided_slice %2 {offsets = [0, 0, 0, 0], sizes = [1, 16, 16, 4], strides = [1, 1, 1, 1]} : vector<1x18x16x4xbf16> to vector<1x16x16x4xbf16>
    %15 = vector.extract_strided_slice %2 {offsets = [0, 1, 0, 0], sizes = [1, 16, 16, 4], strides = [1, 1, 1, 1]} : vector<1x18x16x4xbf16> to vector<1x16x16x4xbf16>
    %16 = vector.extract_strided_slice %2 {offsets = [0, 2, 0, 0], sizes = [1, 16, 16, 4], strides = [1, 1, 1, 1]} : vector<1x18x16x4xbf16> to vector<1x16x16x4xbf16>
    %17 = tpu.concatenate %14, %15, %16 in 3 : vector<1x16x16x4xbf16>, vector<1x16x16x4xbf16>, vector<1x16x16x4xbf16> -> vector<1x16x16x12xbf16>
    %18 = vector.shape_cast %17 : vector<1x16x16x12xbf16> to vector<256x12xbf16>
    %c1 = arith.constant 1 : index
    %c0_8 = arith.constant 0 : index
    %c0_9 = arith.constant 0 : index
    %19 = vector.load %arg2[%c1, %c0_8, %c0_9] : memref<3x12x32xbf16, #tpu.memory_space<vmem>>, vector<1x12x32xbf16>
    %20 = vector.shape_cast %19 : vector<1x12x32xbf16> to vector<12x32xbf16>
    %cst_10 = arith.constant dense<0.000000e+00> : vector<256x32xf32>
    %21 = tpu.matmul %18, %20, %cst_10 {dimension_numbers = #tpu.dot_dimension_numbers<[1], [0], [0], [1], [0, 0, 1, 1], [], []>} : vector<256x12xbf16>, vector<12x32xbf16>, vector<256x32xf32> -> vector<256x32xf32>
    %22 = arith.addf %13, %21 : vector<256x32xf32>
    %23 = vector.extract_strided_slice %2 {offsets = [0, 0, 1, 0], sizes = [1, 18, 15, 4], strides = [1, 1, 1, 1]} : vector<1x18x16x4xbf16> to vector<1x18x15x4xbf16>
    %24 = tpu.concatenate %23, %3 in 2 : vector<1x18x15x4xbf16>, vector<1x18x1x4xbf16> -> vector<1x18x16x4xbf16>
    %25 = vector.extract_strided_slice %24 {offsets = [0, 0, 0, 0], sizes = [1, 16, 16, 4], strides = [1, 1, 1, 1]} : vector<1x18x16x4xbf16> to vector<1x16x16x4xbf16>
    %26 = vector.extract_strided_slice %24 {offsets = [0, 1, 0, 0], sizes = [1, 16, 16, 4], strides = [1, 1, 1, 1]} : vector<1x18x16x4xbf16> to vector<1x16x16x4xbf16>
    %27 = vector.extract_strided_slice %24 {offsets = [0, 2, 0, 0], sizes = [1, 16, 16, 4], strides = [1, 1, 1, 1]} : vector<1x18x16x4xbf16> to vector<1x16x16x4xbf16>
    %28 = tpu.concatenate %25, %26, %27 in 3 : vector<1x16x16x4xbf16>, vector<1x16x16x4xbf16>, vector<1x16x16x4xbf16> -> vector<1x16x16x12xbf16>
    %29 = vector.shape_cast %28 : vector<1x16x16x12xbf16> to vector<256x12xbf16>
    %c2 = arith.constant 2 : index
    %c0_11 = arith.constant 0 : index
    %c0_12 = arith.constant 0 : index
    %30 = vector.load %arg2[%c2, %c0_11, %c0_12] : memref<3x12x32xbf16, #tpu.memory_space<vmem>>, vector<1x12x32xbf16>
    %31 = vector.shape_cast %30 : vector<1x12x32xbf16> to vector<12x32xbf16>
    %cst_13 = arith.constant dense<0.000000e+00> : vector<256x32xf32>
    %32 = tpu.matmul %29, %31, %cst_13 {dimension_numbers = #tpu.dot_dimension_numbers<[1], [0], [0], [1], [0, 0, 1, 1], [], []>} : vector<256x12xbf16>, vector<12x32xbf16>, vector<256x32xf32> -> vector<256x32xf32>
    %33 = arith.addf %22, %32 : vector<256x32xf32>
    %c0_14 = arith.constant 0 : index
    %c0_15 = arith.constant 0 : index
    %34 = vector.load %arg3[%c0_14, %c0_15] : memref<1x32xf32, #tpu.memory_space<vmem>>, vector<1x32xf32>
    %35 = vector.broadcast %34 : vector<1x32xf32> to vector<256x32xf32>
    %36 = arith.addf %33, %35 : vector<256x32xf32>
    %cst_16 = arith.constant 0.000000e+00 : f32
    %37 = vector.broadcast %cst_16 : f32 to vector<256x32xf32>
    %38 = arith.maximumf %36, %37 : vector<256x32xf32>
    %39 = arith.truncf %38 : vector<256x32xf32> to vector<256x32xbf16>
    %40 = vector.shape_cast %39 : vector<256x32xbf16> to vector<1x16x16x32xbf16>
    %cst_17 = arith.constant 0.000000e+00 : bf16
    %41 = vector.broadcast %cst_17 : bf16 to vector<1x1x16x32xbf16>
    %42 = tpu.concatenate %41, %40, %41 in 1 : vector<1x1x16x32xbf16>, vector<1x16x16x32xbf16>, vector<1x1x16x32xbf16> -> vector<1x18x16x32xbf16>
    %cst_18 = arith.constant 0.000000e+00 : bf16
    %43 = vector.broadcast %cst_18 : bf16 to vector<1x18x1x32xbf16>
    %44 = vector.extract_strided_slice %42 {offsets = [0, 0, 0, 0], sizes = [1, 18, 15, 32], strides = [1, 1, 1, 1]} : vector<1x18x16x32xbf16> to vector<1x18x15x32xbf16>
    %45 = tpu.concatenate %43, %44 in 2 : vector<1x18x1x32xbf16>, vector<1x18x15x32xbf16> -> vector<1x18x16x32xbf16>
    %46 = vector.extract_strided_slice %45 {offsets = [0, 0, 0, 0], sizes = [1, 16, 16, 32], strides = [1, 1, 1, 1]} : vector<1x18x16x32xbf16> to vector<1x16x16x32xbf16>
    %47 = vector.extract_strided_slice %45 {offsets = [0, 1, 0, 0], sizes = [1, 16, 16, 32], strides = [1, 1, 1, 1]} : vector<1x18x16x32xbf16> to vector<1x16x16x32xbf16>
    %48 = vector.extract_strided_slice %45 {offsets = [0, 2, 0, 0], sizes = [1, 16, 16, 32], strides = [1, 1, 1, 1]} : vector<1x18x16x32xbf16> to vector<1x16x16x32xbf16>
    %49 = tpu.concatenate %46, %47, %48 in 3 : vector<1x16x16x32xbf16>, vector<1x16x16x32xbf16>, vector<1x16x16x32xbf16> -> vector<1x16x16x96xbf16>
    %50 = vector.shape_cast %49 : vector<1x16x16x96xbf16> to vector<256x96xbf16>
    %c0_19 = arith.constant 0 : index
    %c0_20 = arith.constant 0 : index
    %c0_21 = arith.constant 0 : index
    %51 = vector.load %arg4[%c0_19, %c0_20, %c0_21] : memref<3x96x2xbf16, #tpu.memory_space<vmem>>, vector<1x96x2xbf16>
    %52 = vector.shape_cast %51 : vector<1x96x2xbf16> to vector<96x2xbf16>
    %cst_22 = arith.constant dense<0.000000e+00> : vector<256x2xf32>
    %53 = tpu.matmul %50, %52, %cst_22 {dimension_numbers = #tpu.dot_dimension_numbers<[1], [0], [0], [1], [0, 0, 1, 1], [], []>} : vector<256x96xbf16>, vector<96x2xbf16>, vector<256x2xf32> -> vector<256x2xf32>
    %54 = vector.extract_strided_slice %42 {offsets = [0, 0, 0, 0], sizes = [1, 16, 16, 32], strides = [1, 1, 1, 1]} : vector<1x18x16x32xbf16> to vector<1x16x16x32xbf16>
    %55 = vector.extract_strided_slice %42 {offsets = [0, 1, 0, 0], sizes = [1, 16, 16, 32], strides = [1, 1, 1, 1]} : vector<1x18x16x32xbf16> to vector<1x16x16x32xbf16>
    %56 = vector.extract_strided_slice %42 {offsets = [0, 2, 0, 0], sizes = [1, 16, 16, 32], strides = [1, 1, 1, 1]} : vector<1x18x16x32xbf16> to vector<1x16x16x32xbf16>
    %57 = tpu.concatenate %54, %55, %56 in 3 : vector<1x16x16x32xbf16>, vector<1x16x16x32xbf16>, vector<1x16x16x32xbf16> -> vector<1x16x16x96xbf16>
    %58 = vector.shape_cast %57 : vector<1x16x16x96xbf16> to vector<256x96xbf16>
    %c1_23 = arith.constant 1 : index
    %c0_24 = arith.constant 0 : index
    %c0_25 = arith.constant 0 : index
    %59 = vector.load %arg4[%c1_23, %c0_24, %c0_25] : memref<3x96x2xbf16, #tpu.memory_space<vmem>>, vector<1x96x2xbf16>
    %60 = vector.shape_cast %59 : vector<1x96x2xbf16> to vector<96x2xbf16>
    %cst_26 = arith.constant dense<0.000000e+00> : vector<256x2xf32>
    %61 = tpu.matmul %58, %60, %cst_26 {dimension_numbers = #tpu.dot_dimension_numbers<[1], [0], [0], [1], [0, 0, 1, 1], [], []>} : vector<256x96xbf16>, vector<96x2xbf16>, vector<256x2xf32> -> vector<256x2xf32>
    %62 = arith.addf %53, %61 : vector<256x2xf32>
    %63 = vector.extract_strided_slice %42 {offsets = [0, 0, 1, 0], sizes = [1, 18, 15, 32], strides = [1, 1, 1, 1]} : vector<1x18x16x32xbf16> to vector<1x18x15x32xbf16>
    %64 = tpu.concatenate %63, %43 in 2 : vector<1x18x15x32xbf16>, vector<1x18x1x32xbf16> -> vector<1x18x16x32xbf16>
    %65 = vector.extract_strided_slice %64 {offsets = [0, 0, 0, 0], sizes = [1, 16, 16, 32], strides = [1, 1, 1, 1]} : vector<1x18x16x32xbf16> to vector<1x16x16x32xbf16>
    %66 = vector.extract_strided_slice %64 {offsets = [0, 1, 0, 0], sizes = [1, 16, 16, 32], strides = [1, 1, 1, 1]} : vector<1x18x16x32xbf16> to vector<1x16x16x32xbf16>
    %67 = vector.extract_strided_slice %64 {offsets = [0, 2, 0, 0], sizes = [1, 16, 16, 32], strides = [1, 1, 1, 1]} : vector<1x18x16x32xbf16> to vector<1x16x16x32xbf16>
    %68 = tpu.concatenate %65, %66, %67 in 3 : vector<1x16x16x32xbf16>, vector<1x16x16x32xbf16>, vector<1x16x16x32xbf16> -> vector<1x16x16x96xbf16>
    %69 = vector.shape_cast %68 : vector<1x16x16x96xbf16> to vector<256x96xbf16>
    %c2_27 = arith.constant 2 : index
    %c0_28 = arith.constant 0 : index
    %c0_29 = arith.constant 0 : index
    %70 = vector.load %arg4[%c2_27, %c0_28, %c0_29] : memref<3x96x2xbf16, #tpu.memory_space<vmem>>, vector<1x96x2xbf16>
    %71 = vector.shape_cast %70 : vector<1x96x2xbf16> to vector<96x2xbf16>
    %cst_30 = arith.constant dense<0.000000e+00> : vector<256x2xf32>
    %72 = tpu.matmul %69, %71, %cst_30 {dimension_numbers = #tpu.dot_dimension_numbers<[1], [0], [0], [1], [0, 0, 1, 1], [], []>} : vector<256x96xbf16>, vector<96x2xbf16>, vector<256x2xf32> -> vector<256x2xf32>
    %73 = arith.addf %62, %72 : vector<256x2xf32>
    %c0_31 = arith.constant 0 : index
    %c0_32 = arith.constant 0 : index
    %74 = vector.load %arg5[%c0_31, %c0_32] : memref<1x2xf32, #tpu.memory_space<vmem>>, vector<1x2xf32>
    %75 = vector.broadcast %74 : vector<1x2xf32> to vector<256x2xf32>
    %76 = arith.addf %73, %75 : vector<256x2xf32>
    %77 = vector.shape_cast %76 : vector<256x2xf32> to vector<1x256x2xf32>
    %78 = tpu.transpose %77, [0, 2, 1] : vector<1x256x2xf32> -> vector<1x2x256xf32>
    %79 = arith.negf %78 : vector<1x2x256xf32>
    %80 = math.exp %79 : vector<1x2x256xf32>
    %cst_33 = arith.constant 1.000000e+00 : f32
    %81 = vector.broadcast %cst_33 : f32 to vector<1x2x256xf32>
    %82 = arith.addf %81, %80 : vector<1x2x256xf32>
    %83 = arith.divf %81, %82 : vector<1x2x256xf32>
    %c0_34 = arith.constant 0 : index
    %c0_35 = arith.constant 0 : index
    %c0_36 = arith.constant 0 : index
    %84 = vector.load %arg8[%c0_34, %c0_35, %c0_36] : memref<1x2x256xf32, #tpu.memory_space<vmem>>, vector<1x2x256xf32>
    tpu.vector_store %arg8[%c0_34, %c0_35, %c0_36], %83 {strides = array<i32>} : memref<1x2x256xf32, #tpu.memory_space<vmem>>, vector<1x2x256xf32>,
    %cst_37 = arith.constant 5.000000e-01 : f32
    %85 = vector.broadcast %cst_37 : f32 to vector<1x2x256xf32>
    %86 = arith.cmpf ogt, %83, %85 : vector<1x2x256xf32>
    %87 = arith.extui %86 : vector<1x2x256xi1> to vector<1x2x256xi32>
    %88 = arith.sitofp %87 : vector<1x2x256xi32> to vector<1x2x256xf32>
    %89 = arith.truncf %88 : vector<1x2x256xf32> to vector<1x2x256xbf16>
    %90 = vector.shape_cast %39 : vector<256x32xbf16> to vector<1x256x32xbf16>
    "tpu.trace_start"() <{level = 10 : i32, message = "bmh,bhf->bmf"}> : () -> ()
    %cst_38 = arith.constant dense<0.000000e+00> : vector<1x2x32xf32>
    %91 = tpu.matmul %89, %90, %cst_38 {dimension_numbers = #tpu.dot_dimension_numbers<[2], [1], [1], [2], [0, 0, 0, 1, 1, 2], [0], [0]>} : vector<1x2x256xbf16>, vector<1x256x32xbf16>, vector<1x2x32xf32> -> vector<1x2x32xf32>
    "tpu.trace_stop"() : () -> ()
    %cst_39 = arith.constant dense<0.000000e+00> : vector<1x2xf32>
    %92 = vector.multi_reduction <add>, %88, %cst_39 [2] : vector<1x2x256xf32> to vector<1x2xf32>
    %93 = vector.shape_cast %92 : vector<1x2xf32> to vector<1x2x1xf32>
    %cst_40 = arith.constant 1.000000e+00 : f32
    %94 = vector.broadcast %cst_40 : f32 to vector<1x2x1xf32>
    %95 = arith.maximumf %93, %94 : vector<1x2x1xf32>
    %96 = vector.broadcast %95 : vector<1x2x1xf32> to vector<1x2x32xf32>
    %97 = arith.divf %91, %96 : vector<1x2x32xf32>
    %c0_41 = arith.constant 0 : index
    %c0_42 = arith.constant 0 : index
    %98 = vector.load %arg6[%c0_41, %c0_42] : memref<2x32xf32, #tpu.memory_space<vmem>>, vector<2x32xf32>
    %99 = vector.shape_cast %98 : vector<2x32xf32> to vector<1x2x32xf32>
    %100 = arith.mulf %97, %99 : vector<1x2x32xf32>
    %cst_43 = arith.constant dense<0.000000e+00> : vector<1x2xf32>
    %101 = vector.multi_reduction <add>, %100, %cst_43 [2] : vector<1x2x32xf32> to vector<1x2xf32>
    %102 = vector.extract_strided_slice %101 {offsets = [0, 0], sizes = [1, 1], strides = [1, 1]} : vector<1x2xf32> to vector<1x1xf32>
    %103 = vector.extract_strided_slice %101 {offsets = [0, 1], sizes = [1, 1], strides = [1, 1]} : vector<1x2xf32> to vector<1x1xf32>
    %104 = arith.addf %102, %103 : vector<1x1xf32>
    %c0_44 = arith.constant 0 : index
    %c0_45 = arith.constant 0 : index
    %105 = vector.load %arg7[%c0_44, %c0_45] : memref<1x1xf32, #tpu.memory_space<vmem>>, vector<1x1xf32>
    %106 = arith.addf %104, %105 : vector<1x1xf32>
    %107 = arith.negf %106 : vector<1x1xf32>
    %108 = math.exp %107 : vector<1x1xf32>
    %cst_46 = arith.constant 1.000000e+00 : f32
    %109 = vector.broadcast %cst_46 : f32 to vector<1x1xf32>
    %110 = arith.addf %109, %108 : vector<1x1xf32>
    %111 = arith.divf %109, %110 : vector<1x1xf32>
    %112 = vector.shape_cast %111 : vector<1x1xf32> to vector<1x1x1xf32>
    %c0_47 = arith.constant 0 : index
    %c0_48 = arith.constant 0 : index
    %c0_49 = arith.constant 0 : index
    %113 = vector.load %arg9[%c0_47, %c0_48, %c0_49] : memref<1x1x1xf32, #tpu.memory_space<vmem>>, vector<1x1x1xf32>
    tpu.vector_store %arg9[%c0_47, %c0_48, %c0_49], %112 {strides = array<i32>} : memref<1x1x1xf32, #tpu.memory_space<vmem>>, vector<1x1x1xf32>,
    return
  }
  func.func @transform_0(%arg0: i32) -> (i32, i32, i32, i32) {
    %c0_i32 = arith.constant 0 : i32
    %c0_i32_0 = arith.constant 0 : i32
    %c0_i32_1 = arith.constant 0 : i32
    %c0_i32_2 = arith.constant 0 : i32
    return %arg0, %c0_i32, %c0_i32_0, %c0_i32_1 : i32, i32, i32, i32
  }
  func.func @transform_1(%arg0: i32) -> (i32, i32, i32) {
    %c0_i32 = arith.constant 0 : i32
    %c0_i32_0 = arith.constant 0 : i32
    %c0_i32_1 = arith.constant 0 : i32
    %c0_i32_2 = arith.constant 0 : i32
    return %c0_i32, %c0_i32_0, %c0_i32_1 : i32, i32, i32
  }
  func.func @transform_2(%arg0: i32) -> (i32, i32) {
    %c0_i32 = arith.constant 0 : i32
    %c0_i32_0 = arith.constant 0 : i32
    %c0_i32_1 = arith.constant 0 : i32
    return %c0_i32, %c0_i32_0 : i32, i32
  }
  func.func @transform_3(%arg0: i32) -> (i32, i32, i32) {
    %c0_i32 = arith.constant 0 : i32
    %c0_i32_0 = arith.constant 0 : i32
    %c0_i32_1 = arith.constant 0 : i32
    %c0_i32_2 = arith.constant 0 : i32
    return %c0_i32, %c0_i32_0, %c0_i32_1 : i32, i32, i32
  }
  func.func @transform_4(%arg0: i32) -> (i32, i32) {
    %c0_i32 = arith.constant 0 : i32
    %c0_i32_0 = arith.constant 0 : i32
    %c0_i32_1 = arith.constant 0 : i32
    return %c0_i32, %c0_i32_0 : i32, i32
  }
  func.func @transform_5(%arg0: i32) -> (i32, i32) {
    %c0_i32 = arith.constant 0 : i32
    %c0_i32_0 = arith.constant 0 : i32
    %c0_i32_1 = arith.constant 0 : i32
    return %c0_i32, %c0_i32_0 : i32, i32
  }
  func.func @transform_6(%arg0: i32) -> (i32, i32) {
    %c0_i32 = arith.constant 0 : i32
    %c0_i32_0 = arith.constant 0 : i32
    %c0_i32_1 = arith.constant 0 : i32
    return %c0_i32, %c0_i32_0 : i32, i32
  }
  func.func @transform_7(%arg0: i32) -> (i32, i32, i32) {
    %c0_i32 = arith.constant 0 : i32
    %c0_i32_0 = arith.constant 0 : i32
    %c0_i32_1 = arith.constant 0 : i32
    return %arg0, %c0_i32, %c0_i32_0 : i32, i32, i32
  }
  func.func @transform_8(%arg0: i32) -> (i32, i32, i32) {
    %c0_i32 = arith.constant 0 : i32
    %c0_i32_0 = arith.constant 0 : i32
    %c0_i32_1 = arith.constant 0 : i32
    return %arg0, %c0_i32, %c0_i32_0 : i32, i32, i32
  }
}

</mosaic_0001>

<bundles_post_ra>
// kernel: corner_net_forward.1
= control target key start
LH: loop header
LB: loop body
LE: loop exit
PB: predicated region body
PF: predicated region fallthrough
CT: control target
= control target key end

     0   :  { %s4247_s29 = smov 0   ;;  %s5888_s0 = inlined_call_operand.vmem [shape: bf16[2,16,16,4], index: 0, kind: input, shape index: {}]   ;;  %s5889_s1 = inlined_call_operand.vmem [shape: bf16[3,12,32], index: 1, kind: input, shape index: {}]   ;;  %s5890_s2 = inlined_call_operand.vmem [shape: f32[1,32], index: 2, kind: input, shape index: {}]   ;;  %s5891_s3 = inlined_call_operand.vmem [shape: bf16[3,96,2], index: 3, kind: input, shape index: {}]   ;;  %s5892_s4 = inlined_call_operand.vmem [shape: f32[1,2], index: 4, kind: input, shape index: {}]   ;;  %s5893_s5 = inlined_call_operand.vmem [shape: f32[2,32], index: 5, kind: input, shape index: {}]   ;;  %s5894_s6 = inlined_call_operand.<no memory space> [shape: f32[1,1], index: 6, kind: input, shape index: {}]   ;;  %s5895_s7 = inlined_call_operand.vmem [shape: f32[2,2,256], index: 7, kind: output, shape index: {0}]   ;;  %s5896_s8 = inlined_call_operand.vmem [shape: f32[2,1,1], index: 8, kind: output, shape index: {1}]  }
   0x1   :  { %v14_v0 = vstv %s5894_s6 }
   0x2   :  { %15 = vst [vmem:[#allocation2] sm:$0x1] %v14_v0 }
   0x3 LB: > { %s3556_s30 = sadd.s32 4294967295, %s4190_s29   ;;  %p3560_p0 = scmp.ge.s32.totalorder %s4190_s29, 1  ;;  %s4190_s29 = sphi %s4247_s29, %s21_s29  }
   0x4   : > { %p267_p1 = scmp.lt.s32.totalorder %s4190_s29, 3 }
   0x6   : > { %p268_p2 = pnand %p3560_p0, %p267_p1 }
   0x8   : > { %271 = sbr.rel (%p268_p2) target bundleno = 1436 (0x59c), region = 48 }
   0xd   : > { %p304_p3 = scmp.lt.s32.totalorder %s3556_s30, 1  ;;  %v4149_v1 = vld [vmem:[%s5889_s1 + $0x8] sm:$0x3f]   ;;  %vm921_vm0 = vcmask 1045504   ;;  %s4192_s14 = smov 8   ;;  %vm566_vm1 = vcmask 1040384  }
   0xe   : > { %4115 = vmatprep.subr.msk.bf16.mxu0 %vm921_vm0, %v4149_v1  ;;  %v923_v2 = vsel %vm921_vm0, %v4149_v1, 0  ;;  %s4193_s15 = smov 4   ;;  %v4150_v9 = vld [vmem:[%s5889_s1 + $0x10] sm:$0x3f]   ;;  %v4151_v23 = vld [vmem:[%s5889_s1] sm:$0x3f]  }
   0xf   : > { %s5914_s30 = smov (!%p304_p3, %s3556_s30), 1  ;;  %3882 = vmatpush3.bf16.msra.mxu0 %v923_v2  ;;  %v4328_v13 = vsel %vm921_vm0, %v4150_v9, 0  ;;  %4116 = vmatprep.subr.msk.bf16.mxu1 %vm921_vm0, %v4151_v23  ;;  %v1124_v29 = vsel %vm921_vm0, %v4151_v23, 0  ;;  %vm567_vm2 = vsmask.f32 256  ;;  %v4194_v35 = vmov 0  }
  0x10   : > { %s3740_s10 = sshll.u32 %s5914_s30, 7  ;;  %4117 = vmatprep.subr.msk.bf16.mxu0 %vm921_vm0, %v4150_v9  ;;  %3916 = vmatpush3.bf16.msra.mxu1 %v1124_v29  ;;  %vm4394_vm3 = vmand %vm566_vm1, %vm567_vm2  ;;  %vm1338_vm4 = vcmask 1047552   ;;  %vm1339_vm5 = vsmask.f32 7424  ;;  %vm667_vm7 = vcmask 31744   ;;  %vm716_vm8 = vcmask 64512   ;;  %s316_s6 = scalar_lea.vmem %s5896_s8, %s5914_s30 }
  0x11   : > { %s4264_s13 = scalar_lea.vmem %s5888_s0, %s3740_s10  ;;  %vm4419_vm6 = vmand %vm1338_vm4, %vm1339_vm5  ;;  %vm888_vm9 = vcmask 97280   ;;  %s4195_s20 = smov 64   ;;  %vm2114_vm10 = vcmask 523264   ;;  %vm2066_vm11 = vcmask 261120   ;;  %vm2352_vm12 = vcmask 785408  }
  0x12   : > { %v4269_v3 = vld [vmem:[%s4264_s13 + $0x8] sm:$0xff]   ;;  %v4272_v4 = vld [vmem:[%s4264_s13] sm:$0xff]   ;;  %v4277_v5 = vld [vmem:[%s4264_s13 + $0x10] sm:$0xff]   ;;  %s4196_s25 = smov 32   ;;  %s3741_s21 = sshll.u32 %s5914_s30, 2  ;;  %vm3447_vm14 = vcmask 1041408  }
  0x13   : > { %784 = vrot.lane.b32.xlu1 %v4269_v3, %s4192_s14  ;;  %751 = vrot.lane.b32.xlu0 %v4272_v4, %s4193_s15  ;;  %v4284_v6 = vld [vmem:[%s4264_s13 + $0x18] sm:$0xff]   ;;  %v4291_v7 = vld [vmem:[%s4264_s13 + $0x20] sm:$0xff]   ;;  %v445_v20 = vshrl.u32 %v4269_v3, 16  ;;  %v438_v21 = vshrl.u32 %v4272_v4, 16  ;;  %v448_v25 = vshll.u32 %v4269_v3, 16  ;;  %v452_v26 = vshrl.u32 %v4277_v5, 16  ;;  %s313_s24 = scalar_lea.vmem %s5895_s7, %s3741_s21 }
  0x14   : > { %v4298_v8 = vld [vmem:[%s4264_s13 + $0x28] sm:$0xff]   ;;  %v4308_v10 = vld [vmem:[%s4264_s13 + $0x30] sm:$0xff]   ;;  %v4316_v11 = vld [vmem:[%s4264_s13 + $0x38] sm:$0xff]   ;;  %v441_v28 = vshll.u32 %v4272_v4, 16  ;;  %v455_v32 = vshll.u32 %v4277_v5, 16  ;;  %v459_v44 = vshrl.u32 %v4284_v6, 16 }
  0x15   : > { %v4323_v12 = vld [vmem:[%s4264_s13 + $0x40] sm:$0xff]   ;;  %v4333_v14 = vld [vmem:[%s4264_s13 + $0x48] sm:$0xff]   ;;  %v4340_v15 = vld [vmem:[%s4264_s13 + $0x50] sm:$0xff]   ;;  %v447_v24 = vrot.slane %v445_v20, 7  ;;  %v440_v27 = vrot.slane %v438_v21, 7  ;;  %v454_v31 = vrot.slane %v452_v26, 7 }
  0x16   : > { %v4347_v16 = vld [vmem:[%s4264_s13 + $0x58] sm:$0xff]   ;;  %v4354_v17 = vld [vmem:[%s4264_s13 + $0x60] sm:$0xff]   ;;  %v4361_v18 = vld [vmem:[%s4264_s13 + $0x68] sm:$0xff]   ;;  %v1291_v38 = vrot.slane %v448_v25, 1  ;;  %v1289_v40 = vrot.slane %v441_v28, 1  ;;  %v1293_v43 = vrot.slane %v455_v32, 1 }
  0x17   : > { %786 = vrot.lane.b32.xlu1 %v4277_v5, %s4192_s14  ;;  %753 = vrot.lane.b32.xlu0 %v4269_v3, %s4193_s15  ;;  %v4368_v19 = vld [vmem:[%s4264_s13 + $0x70] sm:$0xff]   ;;  %v4377_v22 = vld [vmem:[%s4264_s13 + $0x78] sm:$0xff]   ;;  %v450_v30 = vor.u32 %v448_v25, %v447_v24  ;;  %v443_v34 = vor.u32 %v441_v28, %v440_v27  ;;  %v457_v37 = vor.u32 %v455_v32, %v454_v31  ;;  %v462_v47 = vshll.u32 %v4284_v6, 16 }
  0x18   : > { %v1292_v42 = vor.u32 %v1291_v38, %v445_v20  ;;  %v1290_v46 = vor.u32 %v1289_v40, %v438_v21  ;;  %v1294_v49 = vor.u32 %v1293_v43, %v452_v26  ;;  %v461_v50 = vrot.slane %v459_v44, 7 }
  0x19   : > { %v4404_v36 = vsel %vm4394_vm3, 0, %v450_v30  ;;  %v4408_v39 = vsel %vm4394_vm3, 0, %v443_v34  ;;  %v4416_v41 = vsel %vm4394_vm3, 0, %v457_v37  ;;  %v466_v51 = vshrl.u32 %v4291_v7, 16 }
  0x1a   : > { %v4430_v48 = vsel %vm4419_vm6, %v1292_v42, 0  ;;  %v4435_v52 = vsel %vm4419_vm6, %v1290_v46, 0  ;;  %v4443_v53 = vsel %vm4419_vm6, %v1294_v49, 0  ;;  %v464_v54 = vor.u32 %v462_v47, %v461_v50 }
  0x1b   : > { %757 = vrot.lane.b32.xlu1 %v4284_v6, %s4193_s15  ;;  %755 = vrot.lane.b32.xlu0 %v4277_v5, %s4193_s15  ;;  %v468_v55 = vrot.slane %v466_v51, 7  ;;  %v469_v56 = vshll.u32 %v4291_v7, 16  ;;  %v1295_v59 = vrot.slane %v462_v47, 1  ;;  %v473_v63 = vshrl.u32 %v4298_v8, 16 }
  0x1c   : > { %v4452_v57 = vsel %vm4394_vm3, 0, %v464_v54  ;;  %v476_v0 = vshll.u32 %v4298_v8, 16  ;;  %v480_v20 = vshrl.u32 %v4308_v10, 16  ;;  %v483_v25 = vshll.u32 %v4308_v10, 16 }
  0x1d   : > { %v471_v58 = vor.u32 %v469_v56, %v468_v55  ;;  %v1296_v61 = vor.u32 %v1295_v59, %v459_v44  ;;  %v1297_v62 = vrot.slane %v469_v56, 1  ;;  %v475_v9 = vrot.slane %v473_v63, 7 }
  0x1e   : > { %v482_v24 = vrot.slane %v480_v20, 7  ;;  %v1299_v28 = vrot.slane %v476_v0, 1  ;;  %v1301_v31 = vrot.slane %v483_v25, 1  ;;  %v487_v32 = vshrl.u32 %v4316_v11, 16 }
  0x1f   : > { %790 = vrot.lane.b32.xlu1 %v4291_v7, %s4192_s14  ;;  %788 = vrot.lane.b32.xlu0 %v4284_v6, %s4192_s14  ;;  %v4460_v60 = vsel %vm4394_vm3, 0, %v471_v58  ;;  %v4470_v1 = vsel %vm4419_vm6, %v1296_v61, 0  ;;  %v1298_v2 = vor.u32 %v1297_v62, %v466_v51  ;;  %v478_v23 = vor.u32 %v476_v0, %v475_v9 }
  0x20   : > { %v485_v27 = vor.u32 %v483_v25, %v482_v24  ;;  %v1300_v30 = vor.u32 %v1299_v28, %v473_v63  ;;  %v490_v34 = vshll.u32 %v4316_v11, 16  ;;  %v1302_v38 = vor.u32 %v1301_v31, %v480_v20 }
  0x21   : > { %v4479_v21 = vsel %vm4419_vm6, %v1298_v2, 0  ;;  %v4488_v26 = vsel %vm4394_vm3, 0, %v478_v23  ;;  %v489_v40 = vrot.slane %v487_v32, 7  ;;  %v494_v42 = vshrl.u32 %v4323_v12, 16 }
  0x22   : > { %v4496_v29 = vsel %vm4394_vm3, 0, %v485_v27  ;;  %v4506_v37 = vsel %vm4419_vm6, %v1300_v30, 0  ;;  %v4515_v43 = vsel %vm4419_vm6, %v1302_v38, 0  ;;  %v497_v47 = vshll.u32 %v4323_v12, 16 }
  0x23   : > { %761 = vrot.lane.b32.xlu1 %v4298_v8, %s4193_s15  ;;  %759 = vrot.lane.b32.xlu0 %v4291_v7, %s4193_s15  ;;  %v492_v44 = vor.u32 %v490_v34, %v489_v40  ;;  %v496_v46 = vrot.slane %v494_v42, 7  ;;  %v1303_v51 = vrot.slane %v490_v34, 1  ;;  %v501_v54 = vshrl.u32 %v4333_v14, 16 }
  0x24   : > { %v1305_v58 = vrot.slane %v497_v47, 1  ;;  %v504_v0 = vshll.u32 %v4333_v14, 16  ;;  %v508_v23 = vshrl.u32 %v4340_v15, 16  ;;  %v511_v28 = vshll.u32 %v4340_v15, 16 }
  0x25   : > { %v4524_v49 = vsel %vm4394_vm3, 0, %v492_v44  ;;  %v499_v50 = vor.u32 %v497_v47, %v496_v46  ;;  %v1304_v56 = vor.u32 %v1303_v51, %v487_v32  ;;  %v503_v63 = vrot.slane %v501_v54, 7 }
  0x26   : > { %v1306_v20 = vor.u32 %v1305_v58, %v494_v42  ;;  %v510_v34 = vrot.slane %v508_v23, 7  ;;  %v1307_v44 = vrot.slane %v504_v0, 1  ;;  %vm3458_vm2 = vcmask 254976  }
  0x27   : > { %794 = vrot.lane.b32.xlu1 %v4308_v10, %s4192_s14  ;;  %792 = vrot.lane.b32.xlu0 %v4298_v8, %s4192_s14  ;;  %v4533_v55 = vsel %vm4394_vm3, 0, %v499_v50  ;;  %v4544_v9 = vsel %vm4419_vm6, %v1304_v56, 0  ;;  %v506_v32 = vor.u32 %v504_v0, %v503_v63  ;;  %v518_v63 = vshll.u32 %v4347_v16, 16 }
  0x28   : > { %v4558_v31 = vsel %vm4419_vm6, %v1306_v20, 0  ;;  %v513_v42 = vor.u32 %v511_v28, %v510_v34  ;;  %v1308_v58 = vor.u32 %v1307_v44, %v501_v54  ;;  %v522_v20 = vshrl.u32 %v4354_v17, 16 }
  0x29   : > { %v4568_v40 = vsel %vm4394_vm3, 0, %v506_v32 }
  0x2a   : > { %v4594_v0 = vsel %vm4419_vm6, %v1308_v58, 0  ;;  %v524_v34 = vrot.slane %v522_v20, 7 }
  0x2b   : > { %765 = vrot.lane.b32.xlu1 %v4316_v11, %s4193_s15  ;;  %763 = vrot.lane.b32.xlu0 %v4308_v10, %s4193_s15 }
  0x2f   : > { %798 = vrot.lane.b32.xlu1 %v4323_v12, %s4192_s14  ;;  %796 = vrot.lane.b32.xlu0 %v4316_v11, %s4192_s14 }
  0x33   : > { %769 = vrot.lane.b32.xlu1 %v4333_v14, %s4193_s15  ;;  %767 = vrot.lane.b32.xlu0 %v4323_v12, %s4193_s15 }
  0x37   : > { %802 = vrot.lane.b32.xlu1 %v4340_v15, %s4192_s14  ;;  %800 = vrot.lane.b32.xlu0 %v4333_v14, %s4192_s14 }
  0x3b   : > { %773 = vrot.lane.b32.xlu1 %v4347_v16, %s4193_s15  ;;  %771 = vrot.lane.b32.xlu0 %v4340_v15, %s4193_s15 }
  0x3f   : > { %806 = vrot.lane.b32.xlu1 %v4354_v17, %s4192_s14  ;;  %804 = vrot.lane.b32.xlu0 %v4347_v16, %s4192_s14 }
  0x43   : > { %777 = vrot.lane.b32.xlu1 %v4361_v18, %s4193_s15  ;;  %775 = vrot.lane.b32.xlu0 %v4354_v17, %s4193_s15 }
  0x47   : > { %810 = vrot.lane.b32.xlu1 %v4368_v19, %s4192_s14  ;;  %808 = vrot.lane.b32.xlu0 %v4361_v18, %s4192_s14 }
  0x4b   : > { %781 = vrot.lane.b32.xlu1 %v4377_v22, %s4193_s15  ;;  %779 = vrot.lane.b32.xlu0 %v4368_v19, %s4193_s15 }
  0x4f   : > { %814 = vrot.lane.b32.xlu1 %v4194_v35, %s4192_s14  ;;  %812 = vrot.lane.b32.xlu0 %v4377_v22, %s4192_s14 }
  0x53   : > { %604 = vrot.lane.b32.xlu1 %v4404_v36, %s4193_s15  ;;  %602 = vrot.lane.b32.xlu0 %v4408_v39, %s4193_s15 }
  0x57   : > { %637 = vrot.lane.b32.xlu1 %v4416_v41, %s4192_s14  ;;  %635 = vrot.lane.b32.xlu0 %v4404_v36, %s4192_s14 }
  0x5b   : > { %1376 = vrot.lane.b32.xlu1 %v4430_v48, %s4193_s15  ;;  %1374 = vrot.lane.b32.xlu0 %v4435_v52, %s4193_s15 }
  0x5f   : > { %1409 = vrot.lane.b32.xlu1 %v4443_v53, %s4192_s14  ;;  %1407 = vrot.lane.b32.xlu0 %v4430_v48, %s4192_s14 }
  0x63   : > { %608 = vrot.lane.b32.xlu1 %v4452_v57, %s4193_s15  ;;  %606 = vrot.lane.b32.xlu0 %v4416_v41, %s4193_s15 }
  0x67   : > { %641 = vrot.lane.b32.xlu1 %v4460_v60, %s4192_s14  ;;  %639 = vrot.lane.b32.xlu0 %v4452_v57, %s4192_s14 }
  0x6b   : > { %1380 = vrot.lane.b32.xlu1 %v4470_v1, %s4193_s15  ;;  %1378 = vrot.lane.b32.xlu0 %v4443_v53, %s4193_s15 }
  0x6f   : > { %1413 = vrot.lane.b32.xlu1 %v4479_v21, %s4192_s14  ;;  %1411 = vrot.lane.b32.xlu0 %v4470_v1, %s4192_s14 }
  0x73   : > { %612 = vrot.lane.b32.xlu1 %v4488_v26, %s4193_s15  ;;  %610 = vrot.lane.b32.xlu0 %v4460_v60, %s4193_s15 }
  0x77   : > { %645 = vrot.lane.b32.xlu1 %v4496_v29, %s4192_s14  ;;  %643 = vrot.lane.b32.xlu0 %v4488_v26, %s4192_s14 }
  0x7b   : > { %1384 = vrot.lane.b32.xlu1 %v4506_v37, %s4193_s15  ;;  %1382 = vrot.lane.b32.xlu0 %v4479_v21, %s4193_s15 }
  0x7f   : > { %1417 = vrot.lane.b32.xlu1 %v4515_v43, %s4192_s14  ;;  %1415 = vrot.lane.b32.xlu0 %v4506_v37, %s4192_s14 }
  0x83   : > { %616 = vrot.lane.b32.xlu1 %v4524_v49, %s4193_s15  ;;  %614 = vrot.lane.b32.xlu0 %v4496_v29, %s4193_s15 }
  0x85   : > { %v785_v59 = vpop.permute.xlu1 %784  ;;  %v752_v61 = vpop.permute.xlu0 %751 }
  0x86   : > { %v817_v62 = vsel %vm667_vm7, 0, %v752_v61 }
  0x87   : > { %649 = vrot.lane.b32.xlu1 %v4533_v55, %s4192_s14  ;;  %647 = vrot.lane.b32.xlu0 %v4524_v49, %s4192_s14  ;;  %v849_v2 = vsel %vm716_vm8, %v817_v62, %v785_v59  ;;  %v1309_v59 = vrot.slane %v511_v28, 1 }
  0x88   : > { %3883 = vmatprep.mubr.msk.bf16.mxu0 %vm888_vm9, %v849_v2 }
  0x89   : > { %v787_v24 = vpop.permute.xlu1 %786  ;;  %v754_v25 = vpop.permute.xlu0 %753  ;;  %v1310_v54 = vor.u32 %v1309_v59, %v508_v23  ;;  %v529_v59 = vshrl.u32 %v4361_v18, 16 }
  0x8a   : > { %v819_v27 = vsel %vm667_vm7, %v4272_v4, %v754_v25 }
  0x8b   : > { %1388 = vrot.lane.b32.xlu1 %v4544_v9, %s4193_s15  ;;  %1386 = vrot.lane.b32.xlu0 %v4515_v43, %s4193_s15  ;;  %v851_v30 = vsel %vm716_vm8, %v819_v27, %v787_v24 }
  0x8c   : > { %3884 = vmatmul.mubr.msk.bf16.vlgmr.msra.gmra.mxu0 %vm888_vm9, %v851_v30 }
  0x8d   : > { %v758_v38 = vpop.permute.xlu1 %757  ;;  %v756_v4 = vpop.permute.xlu0 %755  ;;  %3950 = vmatpush3.bf16.msra.mxu0 %v4328_v13 }
  0x8e   : > { %v823_v46 = vsel %vm667_vm7, %v4277_v5, %v758_v38  ;;  %v821_v50 = vsel %vm667_vm7, %v4269_v3, %v756_v4  ;;  %v4583_v5 = vsel %vm4394_vm3, 0, %v513_v42  ;;  %v515_v3 = vshrl.u32 %v4347_v16, 16 }
  0x8f   : > { %1421 = vrot.lane.b32.xlu1 %v4558_v31, %s4192_s14  ;;  %1419 = vrot.lane.b32.xlu0 %v4544_v9, %s4192_s14 }
  0x90   : > { %v517_v2 = vrot.slane %v515_v3, 7 }
  0x91   : > { %v791_v47 = vpop.permute.xlu1 %790  ;;  %v789_v51 = vpop.permute.xlu0 %788 }
  0x92   : > { %v855_v13 = vsel %vm716_vm8, %v823_v46, %v791_v47  ;;  %v853_v56 = vsel %vm716_vm8, %v821_v50, %v789_v51  ;;  %v520_v23 = vor.u32 %v518_v63, %v517_v2  ;;  %v1311_v46 = vrot.slane %v518_v63, 1 }
  0x93   : > { %620 = vrot.lane.b32.xlu1 %v4568_v40, %s4193_s15  ;;  %3887 = vmatprep.mubr.msk.bf16.mxu0 %vm888_vm9, %v853_v56 }
  0x94   : > { %618 = vrot.lane.b32.xlu0 %v4533_v55, %s4193_s15  ;;  %3888 = vmatmul.mubr.msk.bf16.gmra.mxu0 %vm888_vm9, %v855_v13  ;;  %v4620_v42 = vsel %vm4394_vm3, 0, %v520_v23 }
  0x95   : > { %v762_v61 = vpop.permute.xlu1 %761  ;;  %v760_v62 = vpop.permute.xlu0 %759 }
  0x96   : > { %v827_v24 = vsel %vm667_vm7, %v4291_v7, %v762_v61  ;;  %v825_v27 = vsel %vm667_vm7, %v4284_v6, %v760_v62  ;;  %v4610_v7 = vsel %vm4419_vm6, %v1310_v54, 0  ;;  %v525_v6 = vshll.u32 %v4354_v17, 16 }
  0x97   : > { %653 = vrot.lane.b32.xlu1 %v4583_v5, %s4192_s14  ;;  %v531_v54 = vrot.slane %v529_v59, 7 }
  0x98   : > { %651 = vrot.lane.b32.xlu0 %v4568_v40, %s4192_s14  ;;  %v527_v44 = vor.u32 %v525_v6, %v524_v34  ;;  %v1313_v61 = vrot.slane %v525_v6, 1 }
  0x99   : > { %v795_v25 = vpop.permute.xlu1 %794  ;;  %v793_v30 = vpop.permute.xlu0 %792 }
  0x9a   : > { %v859_v28 = vsel %vm716_vm8, %v827_v24, %v795_v25  ;;  %v857_v32 = vsel %vm716_vm8, %v825_v27, %v793_v30  ;;  %v1314_v24 = vor.u32 %v1313_v61, %v522_v20  ;;  %v532_v25 = vshll.u32 %v4361_v18, 16 }
  0x9b   : > { %1392 = vrot.lane.b32.xlu1 %v4594_v0, %s4193_s15  ;;  %3891 = vmatprep.mubr.msk.bf16.mxu0 %vm888_vm9, %v857_v32 }
  0x9c   : > { %1390 = vrot.lane.b32.xlu0 %v4558_v31, %s4193_s15  ;;  %3892 = vmatmul.mubr.msk.bf16.gmra.mxu0 %vm888_vm9, %v859_v28  ;;  %v534_v20 = vor.u32 %v532_v25, %v531_v54 }
  0x9d   : > { %v766_v38 = vpop.permute.xlu1 %765  ;;  %v764_v4 = vpop.permute.xlu0 %763 }
  0x9e   : > { %v831_v47 = vsel %vm667_vm7, %v4308_v10, %v766_v38  ;;  %v829_v13 = vsel %vm667_vm7, %v4298_v8, %v764_v4  ;;  %v4636_v10 = vsel %vm4394_vm3, 0, %v527_v44  ;;  %v1312_v8 = vor.u32 %v1311_v46, %v515_v3 }
  0x9f   : > { %1425 = vrot.lane.b32.xlu1 %v4610_v7, %s4192_s14  ;;  %v536_v3 = vshrl.u32 %v4368_v19, 16  ;;  %v4672_v44 = vsel %vm4394_vm3, 0, %v534_v20 }
  0xa0   : > { %1423 = vrot.lane.b32.xlu0 %v4594_v0, %s4192_s14  ;;  %v4645_v2 = vsel %vm4419_vm6, %v1312_v8, 0 }
  0xa1   : > { %v799_v50 = vpop.permute.xlu1 %798  ;;  %v797_v56 = vpop.permute.xlu0 %796  ;;  %v538_v6 = vrot.slane %v536_v3, 7 }
  0xa2   : > { %v863_v51 = vsel %vm716_vm8, %v831_v47, %v799_v50  ;;  %v861_v58 = vsel %vm716_vm8, %v829_v13, %v797_v56  ;;  %v1315_v47 = vrot.slane %v532_v25, 1 }
  0xa3   : > { %624 = vrot.lane.b32.xlu1 %v4620_v42, %s4193_s15  ;;  %3895 = vmatprep.mubr.msk.bf16.mxu0 %vm888_vm9, %v861_v58 }
  0xa4   : > { %622 = vrot.lane.b32.xlu0 %v4583_v5, %s4193_s15  ;;  %3896 = vmatmul.mubr.msk.bf16.gmra.mxu0 %vm888_vm9, %v863_v51  ;;  %v1316_v61 = vor.u32 %v1315_v47, %v529_v59  ;;  %v546_v59 = vshll.u32 %v4377_v22, 16 }
  0xa5   : > { %v770_v62 = vpop.permute.xlu1 %769  ;;  %v768_v63 = vpop.permute.xlu0 %767 }
  0xa6   : > { %v835_v27 = vsel %vm667_vm7, %v4323_v12, %v770_v62  ;;  %v833_v30 = vsel %vm667_vm7, %v4316_v11, %v768_v63  ;;  %v4662_v12 = vsel %vm4419_vm6, %v1314_v24, 0  ;;  %v539_v11 = vshll.u32 %v4368_v19, 16 }
  0xa7   : > { %657 = vrot.lane.b32.xlu1 %v4636_v10, %s4192_s14  ;;  %v4697_v24 = vsel %vm4419_vm6, %v1316_v61, 0 }
  0xa8   : > { %655 = vrot.lane.b32.xlu0 %v4620_v42, %s4192_s14  ;;  %v541_v46 = vor.u32 %v539_v11, %v538_v6  ;;  %v1317_v62 = vrot.slane %v539_v11, 1  ;;  %v433_v6 = vrot.slane %v4194_v35, 7 }
  0xa9   : > { %v803_v28 = vpop.permute.xlu1 %802  ;;  %v801_v23 = vpop.permute.xlu0 %800 }
  0xaa   : > { %v867_v32 = vsel %vm716_vm8, %v835_v27, %v803_v28  ;;  %v865_v34 = vsel %vm716_vm8, %v833_v30, %v801_v23  ;;  %v1318_v25 = vor.u32 %v1317_v62, %v536_v3 }
  0xab   : > { %1396 = vrot.lane.b32.xlu1 %v4645_v2, %s4193_s15  ;;  %3899 = vmatprep.mubr.msk.bf16.mxu0 %vm888_vm9, %v865_v34 }
  0xac   : > { %1394 = vrot.lane.b32.xlu0 %v4610_v7, %s4193_s15  ;;  %3900 = vmatmul.mubr.msk.bf16.gmra.mxu0 %vm888_vm9, %v867_v32 }
  0xad   : > { %v774_v38 = vpop.permute.xlu1 %773  ;;  %v772_v4 = vpop.permute.xlu0 %771 }
  0xae   : > { %v839_v50 = vsel %vm667_vm7, %v4340_v15, %v774_v38  ;;  %v837_v51 = vsel %vm667_vm7, %v4333_v14, %v772_v4  ;;  %v4687_v15 = vsel %vm4394_vm3, 0, %v541_v46  ;;  %v543_v14 = vshrl.u32 %v4377_v22, 16 }
  0xaf   : > { %1429 = vrot.lane.b32.xlu1 %v4662_v12, %s4192_s14  ;;  %v1319_v38 = vrot.slane %v546_v59, 1 }
  0xb0   : > { %1427 = vrot.lane.b32.xlu0 %v4645_v2, %s4192_s14  ;;  %v545_v27 = vrot.slane %v543_v14, 7 }
  0xb1   : > { %v807_v13 = vpop.permute.xlu1 %806  ;;  %v805_v58 = vpop.permute.xlu0 %804 }
  0xb2   : > { %v871_v56 = vsel %vm716_vm8, %v839_v50, %v807_v13  ;;  %v869_v8 = vsel %vm716_vm8, %v837_v51, %v805_v58  ;;  %v548_v22 = vor.u32 %v546_v59, %v545_v27 }
  0xb3   : > { %628 = vrot.lane.b32.xlu1 %v4672_v44, %s4193_s15  ;;  %3903 = vmatprep.mubr.msk.bf16.mxu0 %vm888_vm9, %v869_v8  ;;  %v1287_v8 = vrot.slane %v4194_v35, 1 }
  0xb4   : > { %626 = vrot.lane.b32.xlu0 %v4636_v10, %s4193_s15  ;;  %3904 = vmatmul.mubr.msk.bf16.gmra.mxu0 %vm888_vm9, %v871_v56  ;;  %v585_v11 = vsel %vm4394_vm3, 0, %v548_v22  ;;  %v4735_v56 = vsel %vm4394_vm3, 0, %v433_v6 }
  0xb5   : > { %v778_v63 = vpop.permute.xlu1 %777  ;;  %v776_v54 = vpop.permute.xlu0 %775  ;;  %v4756_v59 = vsel %vm4419_vm6, %v1287_v8, 0 }
  0xb6   : > { %v843_v28 = vsel %vm667_vm7, %v4354_v17, %v778_v63  ;;  %v841_v32 = vsel %vm667_vm7, %v4347_v16, %v776_v54  ;;  %v4713_v17 = vsel %vm4419_vm6, %v1318_v25, 0 }
  0xb7   : > { %661 = vrot.lane.b32.xlu1 %v4687_v15, %s4192_s14 }
  0xb8   : > { %659 = vrot.lane.b32.xlu0 %v4672_v44, %s4192_s14 }
  0xb9   : > { %v811_v30 = vpop.permute.xlu1 %810  ;;  %v809_v34 = vpop.permute.xlu0 %808 }
  0xba   : > { %v875_v23 = vsel %vm716_vm8, %v843_v28, %v811_v30  ;;  %v873_v20 = vsel %vm716_vm8, %v841_v32, %v809_v34 }
  0xbb   : > { %1400 = vrot.lane.b32.xlu1 %v4697_v24, %s4193_s15  ;;  %3907 = vmatprep.mubr.msk.bf16.mxu0 %vm888_vm9, %v873_v20 }
  0xbc   : > { %1398 = vrot.lane.b32.xlu0 %v4662_v12, %s4193_s15  ;;  %3908 = vmatmul.mubr.msk.bf16.gmra.mxu0 %vm888_vm9, %v875_v23 }
  0xbd   : > { %v782_v16 = vpop.permute.xlu1 %781  ;;  %v780_v3 = vpop.permute.xlu0 %779 }
  0xbe   : > { %v847_v4 = vsel %vm667_vm7, %v4368_v19, %v782_v16  ;;  %v845_v47 = vsel %vm667_vm7, %v4361_v18, %v780_v3  ;;  %v1320_v19 = vor.u32 %v1319_v38, %v543_v14 }
  0xbf   : > { %1433 = vrot.lane.b32.xlu1 %v4713_v17, %s4192_s14 }
  0xc0   : > { %1431 = vrot.lane.b32.xlu0 %v4697_v24, %s4192_s14  ;;  %v1357_v61 = vsel %vm4419_vm6, %v1320_v19, 0 }
  0xc1   : > { %v815_v46 = vpop.permute.xlu1 %814  ;;  %v813_v13 = vpop.permute.xlu0 %812 }
  0xc2   : > { %v879_v50 = vsel %vm716_vm8, %v847_v4, %v815_v46  ;;  %v877_v51 = vsel %vm716_vm8, %v845_v47, %v813_v13 }
  0xc3   : > { %632 = vrot.lane.b32.xlu1 %v585_v11, %s4193_s15  ;;  %3911 = vmatprep.mubr.msk.bf16.mxu0 %vm888_vm9, %v877_v51 }
  0xc4   : > { %630 = vrot.lane.b32.xlu0 %v4687_v15, %s4193_s15  ;;  %3912 = vmatmul.mubr.msk.bf16.gmra.mxu0 %vm888_vm9, %v879_v50 }
  0xc5   : > { %v605_v18 = vpop.permute.xlu1 %604  ;;  %v603_v58 = vpop.permute.xlu0 %602 }
  0xc6   : > { %v673_v62 = vsel %vm667_vm7, %v4408_v39, %v605_v18  ;;  %v670_v14 = vsel %vm667_vm7, %v4735_v56, %v603_v58 }
  0xc7   : > { %665 = vrot.lane.b32.xlu1 %v4735_v56, %s4192_s14 }
  0xc8   : > { %663 = vrot.lane.b32.xlu0 %v585_v11, %s4192_s14 }
  0xc9   : > { %v638_v63 = vpop.permute.xlu1 %637  ;;  %v636_v25 = vpop.permute.xlu0 %635 }
  0xca   : > { %v720_v54 = vsel %vm716_vm8, %v673_v62, %v638_v63  ;;  %v718_v27 = vsel %vm716_vm8, %v670_v14, %v636_v25 }
  0xcb   : > { %1404 = vrot.lane.b32.xlu1 %v1357_v61, %s4193_s15  ;;  %3917 = vmatprep.mubr.msk.bf16.mxu1 %vm888_vm9, %v718_v27 }
  0xcc   : > { %1402 = vrot.lane.b32.xlu0 %v4713_v17, %s4193_s15  ;;  %3918 = vmatmul.mubr.msk.bf16.vlgmr.msra.gmra.mxu1 %vm888_vm9, %v720_v54 }
  0xcd   : > { %v1377_v39 = vpop.permute.xlu1 %1376  ;;  %v1375_v28 = vpop.permute.xlu0 %1374 }
  0xce   : > { %v1444_v30 = vsel %vm667_vm7, %v4435_v52, %v1377_v39  ;;  %v1441_v23 = vsel %vm667_vm7, %v4756_v59, %v1375_v28 }
  0xcf   : > { %1437 = vrot.lane.b32.xlu1 %v4756_v59, %s4192_s14 }
  0xd0   : > { %1435 = vrot.lane.b32.xlu0 %v1357_v61, %s4192_s14 }
  0xd1   : > { %v1410_v32 = vpop.permute.xlu1 %1409  ;;  %v1408_v20 = vpop.permute.xlu0 %1407 }
  0xd2   : > { %v1490_v34 = vsel %vm716_vm8, %v1444_v30, %v1410_v32  ;;  %v1488_v22 = vsel %vm716_vm8, %v1441_v23, %v1408_v20 }
  0xd3   : > { %3951 = vmatprep.mubr.msk.bf16.mxu0 %vm888_vm9, %v1488_v22  ;;  %2237 = vrot.lane.b32.xlu1 %v4194_v35, %s4195_s20 }
  0xd4   : > { %3952 = vmatmul.mubr.msk.bf16.vlgmr.msra.gmra.mxu0 %vm888_vm9, %v1490_v34 }
  0xd5   : > { %v609_v16 = vpop.permute.xlu1 %608  ;;  %v607_v3 = vpop.permute.xlu0 %606 }
  0xd6   : > { %v679_v6 = vsel %vm667_vm7, %v4416_v41, %v609_v16  ;;  %v676_v52 = vsel %vm667_vm7, %v4404_v36, %v607_v3 }
  0xd9   : > { %v642_v11 = vpop.permute.xlu1 %641  ;;  %v640_v4 = vpop.permute.xlu0 %639 }
  0xda   : > { %v724_v38 = vsel %vm716_vm8, %v679_v6, %v642_v11  ;;  %v722_v46 = vsel %vm716_vm8, %v676_v52, %v640_v4 }
  0xdb   : > { %3921 = vmatprep.mubr.msk.bf16.mxu1 %vm888_vm9, %v722_v46 }
  0xdc   : > { %3922 = vmatmul.mubr.msk.bf16.gmra.mxu1 %vm888_vm9, %v724_v38 }
  0xdd   : > { %v1381_v47 = vpop.permute.xlu1 %1380  ;;  %v1379_v50 = vpop.permute.xlu0 %1378 }
  0xde   : > { %v1450_v13 = vsel %vm667_vm7, %v4443_v53, %v1381_v47  ;;  %v1447_v41 = vsel %vm667_vm7, %v4430_v48, %v1379_v50 }
  0xe1   : > { %v1414_v51 = vpop.permute.xlu1 %1413  ;;  %v1412_v19 = vpop.permute.xlu0 %1411 }
  0xe2   : > { %v1494_v36 = vsel %vm716_vm8, %v1450_v13, %v1414_v51  ;;  %v1492_v18 = vsel %vm716_vm8, %v1447_v41, %v1412_v19 }
  0xe3   : > { %3955 = vmatprep.mubr.msk.bf16.mxu0 %vm888_vm9, %v1492_v18 }
  0xe4   : > { %3956 = vmatmul.mubr.msk.bf16.gmra.mxu0 %vm888_vm9, %v1494_v36 }
  0xe5   : > { %v613_v58 = vpop.permute.xlu1 %612  ;;  %v611_v8 = vpop.permute.xlu0 %610 }
  0xe6   : > { %v685_v61 = vsel %vm667_vm7, %v4460_v60, %v613_v58  ;;  %v682_v53 = vsel %vm667_vm7, %v4452_v57, %v611_v8 }
  0xe9   : > { %v646_v62 = vpop.permute.xlu1 %645  ;;  %v644_v63 = vpop.permute.xlu0 %643 }
  0xea   : > { %v728_v48 = vsel %vm716_vm8, %v685_v61, %v646_v62  ;;  %v726_v14 = vsel %vm716_vm8, %v682_v53, %v644_v63 }
  0xeb   : > { %3925 = vmatprep.mubr.msk.bf16.mxu1 %vm888_vm9, %v726_v14 }
  0xec   : > { %3926 = vmatmul.mubr.msk.bf16.gmra.mxu1 %vm888_vm9, %v728_v48 }
  0xed   : > { %v1385_v54 = vpop.permute.xlu1 %1384  ;;  %v1383_v25 = vpop.permute.xlu0 %1382 }
  0xee   : > { %v1456_v27 = vsel %vm667_vm7, %v4479_v21, %v1385_v54  ;;  %v1453_v60 = vsel %vm667_vm7, %v4470_v1, %v1383_v25 }
  0xf1   : > { %v1418_v39 = vpop.permute.xlu1 %1417  ;;  %v1416_v28 = vpop.permute.xlu0 %1415 }
  0xf2   : > { %v1498_v57 = vsel %vm716_vm8, %v1456_v27, %v1418_v39  ;;  %v1496_v30 = vsel %vm716_vm8, %v1453_v60, %v1416_v28 }
  0xf3   : > { %3959 = vmatprep.mubr.msk.bf16.mxu0 %vm888_vm9, %v1496_v30 }
  0xf4   : > { %3960 = vmatmul.mubr.msk.bf16.gmra.mxu0 %vm888_vm9, %v1498_v57 }
  0xf5   : > { %v617_v32 = vpop.permute.xlu1 %616  ;;  %v615_v23 = vpop.permute.xlu0 %614 }
  0xf6   : > { %v691_v34 = vsel %vm667_vm7, %v4496_v29, %v617_v32  ;;  %v688_v21 = vsel %vm667_vm7, %v4488_v26, %v615_v23 }
  0xf9   : > { %v650_v20 = vpop.permute.xlu1 %649  ;;  %v648_v22 = vpop.permute.xlu0 %647 }
  0xfa   : > { %v732_v1 = vsel %vm716_vm8, %v691_v34, %v650_v20  ;;  %v730_v16 = vsel %vm716_vm8, %v688_v21, %v648_v22 }
  0xfb   : > { %3929 = vmatprep.mubr.msk.bf16.mxu1 %vm888_vm9, %v730_v16 }
  0xfc   : > { %3930 = vmatmul.mubr.msk.bf16.gmra.mxu1 %vm888_vm9, %v732_v1 }
  0xfd   : > { %v1389_v3 = vpop.permute.xlu1 %1388  ;;  %v1387_v6 = vpop.permute.xlu0 %1386 }
  0xfe   : > { %v1462_v11 = vsel %vm667_vm7, %v4515_v43, %v1389_v3  ;;  %v1459_v29 = vsel %vm667_vm7, %v4506_v37, %v1387_v6 }
 0x101   : > { %v1422_v52 = vpop.permute.xlu1 %1421  ;;  %v1420_v38 = vpop.permute.xlu0 %1419 }
 0x102   : > { %v1502_v26 = vsel %vm716_vm8, %v1462_v11, %v1422_v52  ;;  %v1500_v4 = vsel %vm716_vm8, %v1459_v29, %v1420_v38 }
 0x103   : > { %3963 = vmatprep.mubr.msk.bf16.mxu0 %vm888_vm9, %v1500_v4 }
 0x104   : > { %3964 = vmatmul.mubr.msk.bf16.gmra.mxu0 %vm888_vm9, %v1502_v26 }
 0x105   : > { %v621_v46 = vpop.permute.xlu1 %620 }
 0x106   : > { %v619_v47 = vpop.permute.xlu0 %618  ;;  %v697_v50 = vsel %vm667_vm7, %v4533_v55, %v621_v46 }
 0x107   : > { %v694_v43 = vsel %vm667_vm7, %v4524_v49, %v619_v47 }
 0x109   : > { %v654_v13 = vpop.permute.xlu1 %653 }
 0x10a   : > { %v736_v37 = vsel %vm716_vm8, %v697_v50, %v654_v13  ;;  %v652_v51 = vpop.permute.xlu0 %651 }
 0x10b   : > { %v734_v41 = vsel %vm716_vm8, %v694_v43, %v652_v51 }
 0x10c   : > { %3933 = vmatprep.mubr.msk.bf16.mxu1 %vm888_vm9, %v734_v41 }
 0x10d   : > { %3934 = vmatmul.mubr.msk.bf16.gmra.mxu1 %vm888_vm9, %v736_v37  ;;  %v1393_v36 = vpop.permute.xlu1 %1392 }
 0x10e   : > { %v1391_v19 = vpop.permute.xlu0 %1390  ;;  %v1468_v18 = vsel %vm667_vm7, %v4558_v31, %v1393_v36 }
 0x10f   : > { %v1465_v55 = vsel %vm667_vm7, %v4544_v9, %v1391_v19 }
 0x111   : > { %v1426_v58 = vpop.permute.xlu1 %1425 }
 0x112   : > { %v1506_v49 = vsel %vm716_vm8, %v1468_v18, %v1426_v58  ;;  %v1424_v8 = vpop.permute.xlu0 %1423 }
 0x113   : > { %v1504_v61 = vsel %vm716_vm8, %v1465_v55, %v1424_v8 }
 0x114   : > { %3967 = vmatprep.mubr.msk.bf16.mxu0 %vm888_vm9, %v1504_v61 }
 0x115   : > { %3968 = vmatmul.mubr.msk.bf16.gmra.mxu0 %vm888_vm9, %v1506_v49  ;;  %v625_v62 = vpop.permute.xlu1 %624 }
 0x116   : > { %v623_v53 = vpop.permute.xlu0 %622  ;;  %v703_v48 = vsel %vm667_vm7, %v4583_v5, %v625_v62 }
 0x117   : > { %v700_v31 = vsel %vm667_vm7, %v4568_v40, %v623_v53 }
 0x119   : > { %v658_v63 = vpop.permute.xlu1 %657 }
 0x11a   : > { %v740_v9 = vsel %vm716_vm8, %v703_v48, %v658_v63  ;;  %v656_v14 = vpop.permute.xlu0 %655 }
 0x11b   : > { %v738_v54 = vsel %vm716_vm8, %v700_v31, %v656_v14 }
 0x11c   : > { %3937 = vmatprep.mubr.msk.bf16.mxu1 %vm888_vm9, %v738_v54 }
 0x11d   : > { %3938 = vmatmul.mubr.msk.bf16.gmra.mxu1 %vm888_vm9, %v740_v9  ;;  %v1397_v25 = vpop.permute.xlu1 %1396 }
 0x11e   : > { %v1395_v27 = vpop.permute.xlu0 %1394  ;;  %v1474_v5 = vsel %vm667_vm7, %v4610_v7, %v1397_v25 }
 0x11f   : > { %v1471_v40 = vsel %vm667_vm7, %v4594_v0, %v1395_v27 }
 0x121   : > { %v1430_v39 = vpop.permute.xlu1 %1429 }
 0x122   : > { %v1510_v60 = vsel %vm716_vm8, %v1474_v5, %v1430_v39  ;;  %v1428_v57 = vpop.permute.xlu0 %1427 }
 0x123   : > { %v1508_v28 = vsel %vm716_vm8, %v1471_v40, %v1428_v57  ;;  %v4152_v40 = vld [vmem:[%s5891_s3 + $0x28] sm:$0xff]  }
 0x124   : > { %3971 = vmatprep.mubr.msk.bf16.mxu0 %vm888_vm9, %v1508_v28  ;;  %4027 = vmatprep.subr.bf16.mxu0 %v4152_v40  ;;  %v4153_v28 = vld [vmem:[%s5891_s3 + $0x20] sm:$0xff]  }
 0x125   : > { %3972 = vmatmul.mubr.msk.bf16.gmra.mxu0 %vm888_vm9, %v1510_v60  ;;  %v629_v30 = vpop.permute.xlu1 %628 }
 0x126   : > { %v627_v32 = vpop.permute.xlu0 %626  ;;  %v709_v35 = vsel %vm667_vm7, %v4636_v10, %v629_v30  ;;  %4028 = vmatpush3.bf16.msra.mxu0 %v4152_v40 }
 0x127   : > { %v706_v7 = vsel %vm667_vm7, %v4620_v42, %v627_v32  ;;  %4029 = vmatprep.subr.bf16.mxu0 %v4153_v28 }
 0x129   : > { %v662_v23 = vpop.permute.xlu1 %661 }
 0x12a   : > { %v744_v0 = vsel %vm716_vm8, %v709_v35, %v662_v23  ;;  %v660_v34 = vpop.permute.xlu0 %659  ;;  %4030 = vmatpush3.bf16.msra.mxu0 %v4153_v28  ;;  %v4154_v35 = vld [vmem:[%s5891_s3 + $0x18] sm:$0xff]  }
 0x12b   : > { %v742_v20 = vsel %vm716_vm8, %v706_v7, %v660_v34  ;;  %4031 = vmatprep.subr.bf16.mxu0 %v4154_v35  ;;  %v4155_v7 = vld [vmem:[%s5891_s3 + $0x10] sm:$0xff]   ;;  %v4156_v34 = vld [vmem:[%s5891_s3 + $0x8] sm:$0xff]  }
 0x12c   : > { %3941 = vmatprep.mubr.msk.bf16.mxu1 %vm888_vm9, %v742_v20 }
 0x12d   : > { %3942 = vmatmul.mubr.msk.bf16.gmra.mxu1 %vm888_vm9, %v744_v0  ;;  %v1401_v21 = vpop.permute.xlu1 %1400 }
 0x12e   : > { %v1399_v1 = vpop.permute.xlu0 %1398  ;;  %v1480_v22 = vsel %vm667_vm7, %v4662_v12, %v1401_v21  ;;  %4032 = vmatpush3.bf16.msra.mxu0 %v4154_v35 }
 0x12f   : > { %v1477_v10 = vsel %vm667_vm7, %v4645_v2, %v1399_v1  ;;  %4033 = vmatprep.subr.bf16.mxu0 %v4155_v7 }
 0x131   : > { %v1434_v16 = vpop.permute.xlu1 %1433 }
 0x132   : > { %v1514_v42 = vsel %vm716_vm8, %v1480_v22, %v1434_v16  ;;  %v1432_v3 = vpop.permute.xlu0 %1431  ;;  %4034 = vmatpush3.bf16.msra.mxu0 %v4155_v7  ;;  %v4157_v22 = vld [vmem:[%s5891_s3] sm:$0xff]   ;;  %v4158_v16 = vld [vmem:[%s5891_s3 + $0x58] sm:$0xff]  }
 0x133   : > { %v1512_v6 = vsel %vm716_vm8, %v1477_v10, %v1432_v3  ;;  %4035 = vmatprep.subr.bf16.mxu0 %v4156_v34  ;;  %3983 = vmatprep.subr.bf16.mxu1 %v4158_v16 }
 0x134   : > { %3975 = vmatprep.mubr.msk.bf16.mxu0 %vm888_vm9, %v1512_v6  ;;  %3984 = vmatpush3.bf16.msra.mxu1 %v4158_v16 }
 0x135   : > { %3976 = vmatmul.mubr.msk.bf16.gmra.mxu0 %vm888_vm9, %v1514_v42  ;;  %v633_v11 = vpop.permute.xlu1 %632 }
 0x136   : > { %v631_v52 = vpop.permute.xlu0 %630  ;;  %v715_v29 = vsel %vm667_vm7, %v4687_v15, %v633_v11  ;;  %4036 = vmatpush3.bf16.msra.mxu0 %v4156_v34  ;;  %v4159_v11 = vld [vmem:[%s5891_s3 + $0x50] sm:$0xff]  }
 0x137   : > { %v712_v12 = vsel %vm667_vm7, %v4672_v44, %v631_v52  ;;  %4037 = vmatprep.subr.bf16.mxu0 %v4157_v22  ;;  %3985 = vmatprep.subr.bf16.mxu1 %v4159_v11 }
 0x138   : > { %3986 = vmatpush3.bf16.msra.mxu1 %v4159_v11 }
 0x139   : > { %v666_v26 = vpop.permute.xlu1 %665 }
 0x13a   : > { %v748_v2 = vsel %vm716_vm8, %v715_v29, %v666_v26  ;;  %v664_v38 = vpop.permute.xlu0 %663  ;;  %4038 = vmatpush3.bf16.msra.mxu0 %v4157_v22 }
 0x13b   : > { %v746_v4 = vsel %vm716_vm8, %v712_v12, %v664_v38  ;;  %v4971_v12 = vld [vmem:[%s5890_s2] ss:$0 sm:$0xff] }
 0x13c   : > { %3945 = vmatprep.mubr.msk.bf16.mxu1 %vm888_vm9, %v746_v4 }
 0x13d   : > { %3946 = vmatmul.mubr.msk.bf16.gmra.mxu1 %vm888_vm9, %v748_v2  ;;  %v1405_v46 = vpop.permute.xlu1 %1404 }
 0x13e   : > { %v1403_v47 = vpop.permute.xlu0 %1402  ;;  %v1486_v50 = vsel %vm667_vm7, %v4713_v17, %v1405_v46 }
 0x13f   : > { %v1483_v15 = vsel %vm667_vm7, %v4697_v24, %v1403_v47  ;;  %v4160_v47 = vld [vmem:[%s5891_s3 + $0x48] sm:$0xff]  }
 0x140   : > { %3987 = vmatprep.subr.bf16.mxu1 %v4160_v47 }
 0x141   : > { %v1438_v13 = vpop.permute.xlu1 %1437  ;;  %3988 = vmatpush3.bf16.msra.mxu1 %v4160_v47 }
 0x142   : > { %v1518_v44 = vsel %vm716_vm8, %v1486_v50, %v1438_v13  ;;  %v1436_v43 = vpop.permute.xlu0 %1435 }
 0x143   : > { %v1516_v37 = vsel %vm716_vm8, %v1483_v15, %v1436_v43 }
 0x144   : > { %3979 = vmatprep.mubr.msk.bf16.mxu0 %vm888_vm9, %v1516_v37 }
 0x145   : > { %3980 = vmatmul.mubr.msk.bf16.gmra.mxu0 %vm888_vm9, %v1518_v44 }
 0x14c   : > { %v3885_v51 = vpop.f32.mrf.mxu0 }
 0x14e   : > { %v959_v41 = vpop.f32.mrf.mxu0 }
 0x150   : > { %v4884_v36 = vpop.f32.mrf.mxu0 }
 0x152   : > { %v4886_v19 = vpop.f32.mrf.mxu0 }
 0x154   : > { %v4888_v17 = vpop.f32.mrf.mxu0 }
 0x156   : > { %v4890_v18 = vpop.f32.mrf.mxu0 }
 0x158   : > { %v4892_v24 = vpop.f32.mrf.mxu0 }
 0x15a   : > { %v4894_v58 = vpop.f32.mrf.mxu0 }
 0x15c   : > { %v4896_v55 = vpop.f32.mrf.mxu0 }
 0x15e   : > { %v4898_v49 = vpop.f32.mrf.mxu0 }
 0x160   : > { %v4900_v8 = vpop.f32.mrf.mxu0 }
 0x162   : > { %v4902_v61 = vpop.f32.mrf.mxu0 }
 0x164   : > { %v4904_v62 = vpop.f32.mrf.mxu0 }
 0x166   : > { %v4906_v53 = vpop.f32.mrf.mxu0 }
 0x168   : > { %v4908_v48 = vpop.f32.mrf.mxu0 }
 0x16a   : > { %v4910_v63 = vpop.f32.mrf.mxu0 }
 0x16c   : > { %v4912_v31 = vpop.f32.mrf.mxu0 }
 0x16e   : > { %v4914_v9 = vpop.f32.mrf.mxu0 }
 0x170   : > { %v4916_v14 = vpop.f32.mrf.mxu0 }
 0x172   : > { %v4918_v54 = vpop.f32.mrf.mxu0 }
 0x174   : > { %v4920_v25 = vpop.f32.mrf.mxu0 }
 0x176   : > { %v4922_v27 = vpop.f32.mrf.mxu0 }
 0x178   : > { %v4924_v5 = vpop.f32.mrf.mxu0 }
 0x17a   : > { %v4926_v39 = vpop.f32.mrf.mxu0 }
 0x17c   : > { %v4931_v60 = vpop.f32.mrf.mxu0 }
 0x17e   : > { %v4933_v57 = vpop.f32.mrf.mxu0 }
 0x180   : > { %v4938_v30 = vpop.f32.mrf.mxu0 }
 0x182   : > { %v4940_v32 = vpop.f32.mrf.mxu0 }
 0x184   : > { %v4945_v23 = vpop.f32.mrf.mxu0 }
 0x186   : > { %v4950_v0 = vpop.f32.mrf.mxu0 }
 0x188   : > { %v4955_v21 = vpop.f32.mrf.mxu0 }
 0x18a   : > { %v4963_v10 = vpop.f32.mrf.mxu0 }
 0x18c   : > { %v3919_v20 = vpop.f32.mrf.mxu1 }
 0x18d   : > { %v1169_v3 = vadd.f32 %v3919_v20, %v3885_v51 }
 0x18e   : > { %v1160_v1 = vpop.f32.mrf.mxu1 }
 0x18f   : > { %v1161_v52 = vadd.f32 %v1160_v1, %v959_v41  ;;  %v4161_v41 = vld [vmem:[%s5891_s3 + $0x40] sm:$0xff]   ;;  %v4162_v1 = vld [vmem:[%s5891_s3 + $0x38] sm:$0xff]  }
 0x190   : > { %v3920_v42 = vpop.f32.mrf.mxu1  ;;  %3989 = vmatprep.subr.bf16.mxu1 %v4161_v41 }
 0x191   : > { %v1172_v38 = vadd.f32 %v3920_v42, %v4884_v36  ;;  %3990 = vmatpush3.bf16.msra.mxu1 %v4161_v41 }
 0x192   : > { %v1163_v26 = vpop.f32.mrf.mxu1  ;;  %3991 = vmatprep.subr.bf16.mxu1 %v4162_v1 }
 0x193   : > { %v1164_v50 = vadd.f32 %v1163_v26, %v4886_v19  ;;  %v4163_v26 = vld [vmem:[%s5891_s3 + $0x30] sm:$0xff]  }
 0x194   : > { %v3953_v6 = vpop.f32.mrf.mxu0 }
 0x195   : > { %v1725_v29 = vadd.f32 %v3953_v6, %v1169_v3  ;;  %3992 = vmatpush3.bf16.msra.mxu1 %v4162_v1 }
 0x196   : > { %v1596_v2 = vpop.f32.mrf.mxu0  ;;  %3993 = vmatprep.subr.bf16.mxu1 %v4163_v26 }
 0x197   : > { %v1723_v4 = vadd.f32 %v1596_v2, %v1161_v52  ;;  %v1764_v13 = vadd.f32 %v4971_v12, %v1725_v29 }
 0x198   : > { %v3954_v46 = vpop.f32.mrf.mxu0 }
 0x199   : > { %v1726_v15 = vadd.f32 %v3954_v46, %v1172_v38  ;;  %v1762_v43 = vadd.f32 %v4971_v12, %v1723_v4  ;;  %v1796_v40 = vmax.f32 %v1764_v13, 0.0  ;;  %3994 = vmatpush3.bf16.msra.mxu1 %v4163_v26 }
 0x19a   : > { %v1599_v44 = vpop.f32.mrf.mxu0 }
 0x19b   : > { %v1765_v37 = vadd.f32 %v4971_v12, %v1726_v15  ;;  %v1724_v51 = vadd.f32 %v1599_v44, %v1164_v50  ;;  %v1794_v7 = vmax.f32 %v1762_v43, 0.0 }
 0x19c   : > { %v3923_v36 = vpop.f32.mrf.mxu1 }
 0x19d   : > { %v1797_v28 = vmax.f32 %v1765_v37, 0.0  ;;  %v1763_v19 = vadd.f32 %v4971_v12, %v1724_v51  ;;  %v1185_v6 = vadd.f32 %v3923_v36, %v4888_v17 }
 0x19e   : > { %v1176_v35 = vpop.f32.mrf.mxu1 }
 0x19f   : > { %v4985_v34 = vpack.c.bf16 %v1797_v28, %v1796_v40  ;;  %v1795_v20 = vmax.f32 %v1763_v19, 0.0  ;;  %v1177_v47 = vadd.f32 %v1176_v35, %v4890_v18 }
 0x1a0   : > { %v3924_v3 = vpop.f32.mrf.mxu1 }
 0x1a1   : > { %v4990_v22 = vpack.c.bf16 %v1795_v20, %v1794_v7  ;;  %2207 = vrot.lane.b32.xlu0 %v4985_v34, %s4195_s20  ;;  %2177 = vrot.lane.b32.xlu1 %v4985_v34, %s4196_s25  ;;  %v1850_v16 = vshrl.u32 %v4985_v34, 16  ;;  %v1853_v42 = vshll.u32 %v4985_v34, 16  ;;  %v1188_v17 = vadd.f32 %v3924_v3, %v4892_v24 }
 0x1a2   : > { %v1179_v4 = vpop.f32.mrf.mxu1 }
 0x1a3   : > { %v1852_v11 = vrot.slane %v1850_v16, 7  ;;  %v2777_v52 = vrot.slane %v1853_v42, 1  ;;  %v1843_v44 = vshrl.u32 %v4990_v22, 16  ;;  %v1180_v43 = vadd.f32 %v1179_v4, %v4894_v58 }
 0x1a4   : > { %v3957_v29 = vpop.f32.mrf.mxu0  ;;  %v1846_v19 = vshll.u32 %v4990_v22, 16 }
 0x1a5   : > { %v1729_v2 = vadd.f32 %v3957_v29, %v1185_v6  ;;  %2175 = vrot.lane.b32.xlu0 %v4990_v22, %s4196_s25  ;;  %v1855_v38 = vor.u32 %v1853_v42, %v1852_v11  ;;  %v2778_v13 = vor.u32 %v2777_v52, %v1850_v16  ;;  %v1845_v58 = vrot.slane %v1843_v44, 7 }
 0x1a6   : > { %v1612_v46 = vpop.f32.mrf.mxu0  ;;  %v2775_v11 = vrot.slane %v1846_v19, 1 }
 0x1a7   : > { %v5008_v50 = vsel %vm4394_vm3, 0, %v1855_v38  ;;  %v1768_v37 = vadd.f32 %v4971_v12, %v1729_v2  ;;  %v1727_v51 = vadd.f32 %v1612_v46, %v1177_v47  ;;  %v5020_v40 = vsel %vm4419_vm6, %v2778_v13, 0 }
 0x1a8   : > { %v3958_v15 = vpop.f32.mrf.mxu0  ;;  %2004 = vrot.lane.b32.xlu1 %v5008_v50, %s4196_s25  ;;  %v1848_v6 = vor.u32 %v1846_v19, %v1845_v58  ;;  %v2776_v13 = vor.u32 %v2775_v11, %v1843_v44 }
 0x1a9   : > { %v1730_v18 = vadd.f32 %v3958_v15, %v1188_v17  ;;  %2034 = vrot.lane.b32.xlu0 %v5008_v50, %s4195_s20  ;;  %v1800_v35 = vmax.f32 %v1768_v37, 0.0  ;;  %v1766_v7 = vadd.f32 %v4971_v12, %v1727_v51 }
 0x1aa   : > { %v1615_v24 = vpop.f32.mrf.mxu0  ;;  %v5042_v17 = vsel %vm4394_vm3, 0, %v1848_v6  ;;  %v5055_v44 = vsel %vm4419_vm6, %v2776_v13, 0 }
 0x1ab   : > { %v1769_v41 = vadd.f32 %v4971_v12, %v1730_v18  ;;  %v1728_v36 = vadd.f32 %v1615_v24, %v1180_v43  ;;  %v1798_v52 = vmax.f32 %v1766_v7, 0.0 }
 0x1ac   : > { %2857 = vrot.lane.b32.xlu1 %v5020_v40, %s4196_s25  ;;  %v3927_v28 = vpop.f32.mrf.mxu1 }
 0x1ad   : > { %v1801_v20 = vmax.f32 %v1769_v41, 0.0  ;;  %v1767_v1 = vadd.f32 %v4971_v12, %v1728_v36  ;;  %2887 = vrot.lane.b32.xlu0 %v5020_v40, %s4195_s20  ;;  %v1201_v38 = vadd.f32 %v3927_v28, %v4896_v55 }
 0x1ae   : > { %v1192_v3 = vpop.f32.mrf.mxu1 }
 0x1af   : > { %v5029_v16 = vpack.c.bf16 %v1801_v20, %v1800_v35  ;;  %v1799_v42 = vmax.f32 %v1767_v1, 0.0 }
 0x1b0   : > { %v3928_v46 = vpop.f32.mrf.mxu1 }
 0x1b1   : > { %2181 = vrot.lane.b32.xlu1 %v5029_v16, %s4196_s25  ;;  %2211 = vrot.lane.b32.xlu0 %v5029_v16, %s4195_s20  ;;  %v1864_v29 = vshrl.u32 %v5029_v16, 16  ;;  %v1867_v26 = vshll.u32 %v5029_v16, 16  ;;  %v5037_v2 = vpack.c.bf16 %v1799_v42, %v1798_v52  ;;  %v1204_v55 = vadd.f32 %v3928_v46, %v4900_v8 }
 0x1b2   : > { %v1195_v8 = vpop.f32.mrf.mxu1 }
 0x1b3   : > { %v1866_v4 = vrot.slane %v1864_v29, 7  ;;  %v2781_v15 = vrot.slane %v1867_v26, 1  ;;  %v1857_v36 = vshrl.u32 %v5037_v2, 16  ;;  %v1860_v1 = vshll.u32 %v5037_v2, 16 }
 0x1b4   : > { %v3961_v47 = vpop.f32.mrf.mxu0  ;;  %v1196_v42 = vadd.f32 %v1195_v8, %v4902_v61 }
 0x1b5   : > { %v1733_v43 = vadd.f32 %v3961_v47, %v1201_v38  ;;  %2209 = vrot.lane.b32.xlu1 %v5037_v2, %s4195_s20  ;;  %2002 = vrot.lane.b32.xlu0 %v5042_v17, %s4196_s25  ;;  %v1869_v37 = vor.u32 %v1867_v26, %v1866_v4  ;;  %v2782_v41 = vor.u32 %v2781_v15, %v1864_v29  ;;  %v1859_v20 = vrot.slane %v1857_v36, 7 }
 0x1b6   : > { %v1628_v51 = vpop.f32.mrf.mxu0  ;;  %v1193_v29 = vadd.f32 %v1192_v3, %v4898_v49  ;;  %v2779_v46 = vrot.slane %v1860_v1, 1 }
 0x1b7   : > { %v5051_v18 = vsel %vm4394_vm3, 0, %v1869_v37  ;;  %v1772_v28 = vadd.f32 %v4971_v12, %v1733_v43  ;;  %v5066_v7 = vsel %vm4419_vm6, %v2782_v41, 0  ;;  %v1862_v4 = vor.u32 %v1860_v1, %v1859_v20 }
 0x1b8   : > { %v3962_v24 = vpop.f32.mrf.mxu0  ;;  %v1731_v47 = vadd.f32 %v1628_v51, %v1193_v29  ;;  %v2780_v49 = vor.u32 %v2779_v46, %v1857_v36 }
 0x1b9   : > { %v1734_v58 = vadd.f32 %v3962_v24, %v1204_v55  ;;  %2008 = vrot.lane.b32.xlu1 %v5051_v18, %s4196_s25  ;;  %2855 = vrot.lane.b32.xlu0 %v5055_v44, %s4196_s25  ;;  %v1804_v6 = vmax.f32 %v1772_v28, 0.0  ;;  %v5084_v43 = vsel %vm4394_vm3, 0, %v1862_v4 }
 0x1ba   : > { %v1631_v35 = vpop.f32.mrf.mxu0  ;;  %v1770_v37 = vadd.f32 %v4971_v12, %v1731_v47  ;;  %v5094_v28 = vsel %vm4419_vm6, %v2780_v49, 0 }
 0x1bb   : > { %v1773_v19 = vadd.f32 %v4971_v12, %v1734_v58  ;;  %v1732_v38 = vadd.f32 %v1631_v35, %v1196_v42 }
 0x1bc   : > { %v3931_v52 = vpop.f32.mrf.mxu1  ;;  %v1802_v8 = vmax.f32 %v1770_v37, 0.0 }
 0x1bd   : > { %v1805_v11 = vmax.f32 %v1773_v19, 0.0  ;;  %2861 = vrot.lane.b32.xlu1 %v5066_v7, %s4196_s25  ;;  %2179 = vrot.lane.b32.xlu0 %v5037_v2, %s4196_s25  ;;  %v1771_v13 = vadd.f32 %v4971_v12, %v1732_v38  ;;  %v1217_v20 = vadd.f32 %v3931_v52, %v4904_v62 }
 0x1be   : > { %v1208_v61 = vpop.f32.mrf.mxu1 }
 0x1bf   : > { %v5075_v26 = vpack.c.bf16 %v1805_v11, %v1804_v6  ;;  %v1803_v24 = vmax.f32 %v1771_v13, 0.0 }
 0x1c0   : > { %v3932_v51 = vpop.f32.mrf.mxu1 }
 0x1c1   : > { %2185 = vrot.lane.b32.xlu1 %v5075_v26, %s4196_s25  ;;  %2038 = vrot.lane.b32.xlu0 %v5051_v18, %s4195_s20  ;;  %v1878_v3 = vshrl.u32 %v5075_v26, 16  ;;  %v1881_v36 = vshll.u32 %v5075_v26, 16  ;;  %v1220_v19 = vadd.f32 %v3932_v51, %v4908_v48  ;;  %v5102_v35 = vpack.c.bf16 %v1803_v24, %v1802_v8 }
 0x1c2   : > { %v1211_v48 = vpop.f32.mrf.mxu1 }
 0x1c3   : > { %v1880_v58 = vrot.slane %v1878_v3, 7  ;;  %v2785_v6 = vrot.slane %v1881_v36, 1  ;;  %v1871_v62 = vshrl.u32 %v5102_v35, 16  ;;  %v1212_v47 = vadd.f32 %v1211_v48, %v4910_v63 }
 0x1c4   : > { %v3965_v15 = vpop.f32.mrf.mxu0 }
 0x1c5   : > { %2036 = vrot.lane.b32.xlu1 %v5084_v43, %s4195_s20  ;;  %2891 = vrot.lane.b32.xlu0 %v5066_v7, %s4195_s20  ;;  %v1883_v42 = vor.u32 %v1881_v36, %v1880_v58  ;;  %v1737_v11 = vadd.f32 %v3965_v15, %v1217_v20  ;;  %v2786_v4 = vor.u32 %v2785_v6, %v1878_v3  ;;  %v1873_v24 = vrot.slane %v1871_v62, 7 }
 0x1c6   : > { %v1644_v55 = vpop.f32.mrf.mxu0  ;;  %v1209_v15 = vadd.f32 %v1208_v61, %v4906_v53 }
 0x1c7   : > { %v5112_v38 = vsel %vm4394_vm3, 0, %v1883_v42  ;;  %v1776_v52 = vadd.f32 %v4971_v12, %v1737_v11  ;;  %v5124_v3 = vsel %vm4419_vm6, %v2786_v4, 0 }
 0x1c8   : > { %v3966_v41 = vpop.f32.mrf.mxu0  ;;  %v1735_v63 = vadd.f32 %v1644_v55, %v1209_v15 }
 0x1c9   : > { %2889 = vrot.lane.b32.xlu1 %v5094_v28, %s4195_s20  ;;  %2215 = vrot.lane.b32.xlu0 %v5075_v26, %s4195_s20  ;;  %v1738_v1 = vadd.f32 %v3966_v41, %v1220_v19  ;;  %v1874_v41 = vshll.u32 %v5102_v35, 16  ;;  %v1808_v58 = vmax.f32 %v1776_v52, 0.0 }
 0x1ca   : > { %v1647_v46 = vpop.f32.mrf.mxu0  ;;  %v1774_v55 = vadd.f32 %v4971_v12, %v1735_v63 }
 0x1cb   : > { %v1777_v29 = vadd.f32 %v4971_v12, %v1738_v1  ;;  %v1736_v37 = vadd.f32 %v1647_v46, %v1212_v47  ;;  %v1876_v19 = vor.u32 %v1874_v41, %v1873_v24  ;;  %v2783_v20 = vrot.slane %v1874_v41, 1  ;;  %v5137_v1 = vld [vmem:[%s5891_s3 + $0x88] sm:$0xff]  }
 0x1cc   : > { %4071 = vmatprep.subr.bf16.mxu1 %v5137_v1  ;;  %v1806_v46 = vmax.f32 %v1774_v55, 0.0 }
 0x1cd   : > { %2213 = vrot.lane.b32.xlu1 %v5102_v35, %s4195_s20  ;;  %2006 = vrot.lane.b32.xlu0 %v5084_v43, %s4196_s25  ;;  %v3935_v13 = vpop.f32.mrf.mxu1  ;;  %v1809_v49 = vmax.f32 %v1777_v29, 0.0  ;;  %v1775_v61 = vadd.f32 %v4971_v12, %v1736_v37  ;;  %v5147_v48 = vsel %vm4394_vm3, 0, %v1876_v19  ;;  %v2784_v29 = vor.u32 %v2783_v20, %v1871_v62 }
 0x1ce   : > { %v1233_v15 = vadd.f32 %v3935_v13, %v4912_v31 }
 0x1cf   : > { %v1224_v36 = vpop.f32.mrf.mxu1  ;;  %v5131_v53 = vpack.c.bf16 %v1809_v49, %v1808_v58  ;;  %v1807_v6 = vmax.f32 %v1775_v61, 0.0  ;;  %v5160_v62 = vsel %vm4419_vm6, %v2784_v29, 0 }
 0x1d0   : > { %v1225_v61 = vadd.f32 %v1224_v36, %v4914_v9 }
 0x1d1   : > { %2012 = vrot.lane.b32.xlu1 %v5112_v38, %s4196_s25  ;;  %2859 = vrot.lane.b32.xlu0 %v5094_v28, %s4196_s25  ;;  %v3936_v42 = vpop.f32.mrf.mxu1  ;;  %v1892_v4 = vshrl.u32 %v5131_v53, 16  ;;  %v5156_v37 = vpack.c.bf16 %v1807_v6, %v1806_v46  ;;  %v1895_v13 = vshll.u32 %v5131_v53, 16 }
 0x1d2   : > { %v1236_v52 = vadd.f32 %v3936_v42, %v4916_v14 }
 0x1d3   : > { %v1227_v47 = vpop.f32.mrf.mxu1  ;;  %v1894_v14 = vrot.slane %v1892_v4, 7  ;;  %v1885_v42 = vshrl.u32 %v5156_v37, 16 }
 0x1d4   : > { %v1228_v31 = vadd.f32 %v1227_v47, %v4918_v54  ;;  %v1888_v47 = vshll.u32 %v5156_v37, 16 }
 0x1d5   : > { %v3969_v51 = vpop.f32.mrf.mxu0  ;;  %2865 = vrot.lane.b32.xlu1 %v5124_v3, %s4196_s25  ;;  %2183 = vrot.lane.b32.xlu0 %v5102_v35, %s4196_s25  ;;  %v1887_v46 = vrot.slane %v1885_v42, 7 }
 0x1d6   : > { %v1741_v41 = vadd.f32 %v3969_v51, %v1233_v15  ;;  %v1897_v51 = vor.u32 %v1895_v13, %v1894_v14 }
 0x1d7   : > { %v1660_v8 = vpop.f32.mrf.mxu0 }
 0x1d8   : > { %v1780_v6 = vadd.f32 %v4971_v12, %v1741_v41  ;;  %v1739_v54 = vadd.f32 %v1660_v8, %v1225_v61 }
 0x1d9   : > { %2189 = vrot.lane.b32.xlu1 %v5131_v53, %s4196_s25  ;;  %2042 = vrot.lane.b32.xlu0 %v5112_v38, %s4195_s20  ;;  %v3970_v11 = vpop.f32.mrf.mxu0 }
 0x1da   : > { %v1742_v49 = vadd.f32 %v3970_v11, %v1236_v52  ;;  %v5183_v52 = vsel %vm4394_vm3, 0, %v1897_v51  ;;  %v1812_v15 = vmax.f32 %v1780_v6, 0.0  ;;  %v1778_v8 = vadd.f32 %v4971_v12, %v1739_v54 }
 0x1db   : > { %v1663_v58 = vpop.f32.mrf.mxu0 }
 0x1dc   : > { %v1781_v63 = vadd.f32 %v4971_v12, %v1742_v49  ;;  %v1740_v19 = vadd.f32 %v1663_v58, %v1228_v31  ;;  %v1890_v31 = vor.u32 %v1888_v47, %v1887_v46 }
 0x1dd   : > { %2040 = vrot.lane.b32.xlu1 %v5147_v48, %s4195_s20  ;;  %2895 = vrot.lane.b32.xlu0 %v5124_v3, %s4195_s20  ;;  %v3939_v24 = vpop.f32.mrf.mxu1 }
 0x1de   : > { %v1813_v11 = vmax.f32 %v1781_v63, 0.0  ;;  %v1779_v9 = vadd.f32 %v4971_v12, %v1740_v19  ;;  %v2787_v63 = vrot.slane %v1888_v47, 1  ;;  %v1810_v19 = vmax.f32 %v1778_v8, 0.0 }
 0x1df   : > { %v1240_v20 = vpop.f32.mrf.mxu1  ;;  %v1249_v6 = vadd.f32 %v3939_v24, %v4920_v25 }
 0x1e0   : > { %v5191_v49 = vpack.c.bf16 %v1813_v11, %v1812_v15  ;;  %v1811_v14 = vmax.f32 %v1779_v9, 0.0  ;;  %v5203_v9 = vsel %vm4394_vm3, 0, %v1890_v31  ;;  %v2788_v46 = vor.u32 %v2787_v63, %v1885_v42 }
 0x1e1   : > { %2893 = vrot.lane.b32.xlu1 %v5160_v62, %s4195_s20  ;;  %2219 = vrot.lane.b32.xlu0 %v5131_v53, %s4195_s20  ;;  %v3940_v36 = vpop.f32.mrf.mxu1  ;;  %v1241_v31 = vadd.f32 %v1240_v20, %v4922_v27 }
 0x1e2   : > { %v1252_v61 = vadd.f32 %v3940_v36, %v4924_v5  ;;  %v5199_v11 = vpack.c.bf16 %v1811_v14, %v1810_v19  ;;  %v5212_v24 = vsel %vm4419_vm6, %v2788_v46, 0 }
 0x1e3   : > { %v1243_v41 = vpop.f32.mrf.mxu1 }
 0x1e4   : > { %v1899_v8 = vshrl.u32 %v5199_v11, 16  ;;  %v1244_v42 = vadd.f32 %v1243_v41, %v4926_v39 }
 0x1e5   : > { %v3973_v55 = vpop.f32.mrf.mxu0  ;;  %2217 = vrot.lane.b32.xlu1 %v5156_v37, %s4195_s20  ;;  %2010 = vrot.lane.b32.xlu0 %v5147_v48, %s4196_s25 }
 0x1e6   : > { %v1745_v47 = vadd.f32 %v3973_v55, %v1249_v6  ;;  %v1901_v6 = vrot.slane %v1899_v8, 7 }
 0x1e7   : > { %v1676_v29 = vpop.f32.mrf.mxu0 }
 0x1e8   : > { %v1784_v55 = vadd.f32 %v4971_v12, %v1745_v47  ;;  %v1743_v39 = vadd.f32 %v1676_v29, %v1241_v31  ;;  %v1902_v47 = vshll.u32 %v5199_v11, 16 }
 0x1e9   : > { %2016 = vrot.lane.b32.xlu1 %v5183_v52, %s4196_s25  ;;  %2863 = vrot.lane.b32.xlu0 %v5160_v62, %s4196_s25  ;;  %v3974_v58 = vpop.f32.mrf.mxu0 }
 0x1ea   : > { %v1746_v54 = vadd.f32 %v3974_v58, %v1252_v61 }
 0x1eb   : > { %v1679_v5 = vpop.f32.mrf.mxu0 }
 0x1ec   : > { %v1785_v15 = vadd.f32 %v4971_v12, %v1746_v54  ;;  %v1744_v61 = vadd.f32 %v1679_v5, %v1244_v42  ;;  %v1816_v54 = vmax.f32 %v1784_v55, 0.0  ;;  %v1782_v55 = vadd.f32 %v4971_v12, %v1743_v39 }
 0x1ed   : > { %2193 = vrot.lane.b32.xlu1 %v5191_v49, %s4196_s25  ;;  %2187 = vrot.lane.b32.xlu0 %v5156_v37, %s4196_s25  ;;  %v3943_v51 = vpop.f32.mrf.mxu1 }
 0x1ee   : > { %v1817_v63 = vmax.f32 %v1785_v15, 0.0  ;;  %v1783_v20 = vadd.f32 %v4971_v12, %v1744_v61  ;;  %v1265_v5 = vadd.f32 %v3943_v51, %v4931_v60 }
 0x1ef   : > { %v1256_v36 = vpop.f32.mrf.mxu1 }
 0x1f0   : > { %v5230_v27 = vpack.c.bf16 %v1817_v63, %v1816_v54  ;;  %v1815_v61 = vmax.f32 %v1783_v20, 0.0  ;;  %v1257_v60 = vadd.f32 %v1256_v36, %v4933_v57  ;;  %v1814_v54 = vmax.f32 %v1782_v55, 0.0 }
 0x1f1   : > { %2044 = vrot.lane.b32.xlu1 %v5203_v9, %s4195_s20  ;;  %2046 = vrot.lane.b32.xlu0 %v5183_v52, %s4195_s20  ;;  %v3944_v14 = vpop.f32.mrf.mxu1 }
 0x1f2   : > { %v1268_v41 = vadd.f32 %v3944_v14, %v4938_v30  ;;  %v1904_v30 = vor.u32 %v1902_v47, %v1901_v6 }
 0x1f3   : > { %v1259_v46 = vpop.f32.mrf.mxu1 }
 0x1f4   : > { %v1260_v14 = vadd.f32 %v1259_v46, %v4940_v32  ;;  %v5246_v6 = vsel %vm4394_vm3, 0, %v1904_v30 }
 0x1f5   : > { %v3977_v25 = vpop.f32.mrf.mxu0  ;;  %2897 = vrot.lane.b32.xlu1 %v5212_v24, %s4195_s20  ;;  %2223 = vrot.lane.b32.xlu0 %v5191_v49, %s4195_s20 }
 0x1f6   : > { %v1749_v31 = vadd.f32 %v3977_v25, %v1265_v5 }
 0x1f7   : > { %v1692_v58 = vpop.f32.mrf.mxu0 }
 0x1f8   : > { %v1788_v32 = vadd.f32 %v4971_v12, %v1749_v31  ;;  %v1747_v25 = vadd.f32 %v1692_v58, %v1257_v60 }
 0x1f9   : > { %v3978_v19 = vpop.f32.mrf.mxu0  ;;  %2221 = vrot.lane.b32.xlu1 %v5199_v11, %s4195_s20  ;;  %2014 = vrot.lane.b32.xlu0 %v5203_v9, %s4196_s25 }
 0x1fa   : > { %v1750_v15 = vadd.f32 %v3978_v19, %v1268_v41  ;;  %v5253_v41 = vpack.c.bf16 %v1815_v61, %v1814_v54  ;;  %v1820_v5 = vmax.f32 %v1788_v32, 0.0 }
 0x1fb   : > { %v1695_v42 = vpop.f32.mrf.mxu0 }
 0x1fc   : > { %v1789_v51 = vadd.f32 %v4971_v12, %v1750_v15  ;;  %v1748_v19 = vadd.f32 %v1695_v42, %v1260_v14  ;;  %v1786_v15 = vadd.f32 %v4971_v12, %v1747_v25 }
 0x1fd   : > { %v3947_v29 = vpop.f32.mrf.mxu1  ;;  %2197 = vrot.lane.b32.xlu1 %v5230_v27, %s4196_s25  ;;  %2867 = vrot.lane.b32.xlu0 %v5212_v24, %s4196_s25 }
 0x1fe   : > { %v1821_v57 = vmax.f32 %v1789_v51, 0.0  ;;  %v1787_v36 = vadd.f32 %v4971_v12, %v1748_v19  ;;  %v1281_v46 = vadd.f32 %v3947_v29, %v4945_v23  ;;  %v1818_v60 = vmax.f32 %v1786_v15, 0.0 }
 0x1ff   : > { %v1272_v63 = vpop.f32.mrf.mxu1 }
 0x200   : > { %v5262_v55 = vpack.c.bf16 %v1821_v57, %v1820_v5  ;;  %v1819_v14 = vmax.f32 %v1787_v36, 0.0  ;;  %v1273_v31 = vadd.f32 %v1272_v63, %v4950_v0  ;;  %v5285_v5 = vpop.permute.xlu1 %2237 }
 0x201   : > { %v3948_v39 = vpop.f32.mrf.mxu1  ;;  %2048 = vrot.lane.b32.xlu1 %v5246_v6, %s4195_s20  ;;  %2191 = vrot.lane.b32.xlu0 %v5199_v11, %s4196_s25 }
 0x202   : > { %v1284_v23 = vadd.f32 %v3948_v39, %v4955_v21  ;;  %v5272_v25 = vpack.c.bf16 %v1819_v14, %v1818_v60 }
 0x203   : > { %v1275_v42 = vpop.f32.mrf.mxu1 }
 0x204   : > { %v1276_v29 = vadd.f32 %v1275_v42, %v4963_v10 }
 0x205   : > { %v3981_v20 = vpop.f32.mrf.mxu0  ;;  %2225 = vrot.lane.b32.xlu1 %v5253_v41, %s4195_s20  ;;  %2227 = vrot.lane.b32.xlu0 %v5230_v27, %s4195_s20 }
 0x206   : > { %v1753_v58 = vadd.f32 %v3981_v20, %v1281_v46  ;;  %v2789_v20 = vrot.slane %v1895_v13, 1  ;;  %v2791_v13 = vrot.slane %v1902_v47, 1 }
 0x207   : > { %v1708_v30 = vpop.f32.mrf.mxu0 }
 0x208   : > { %v1792_v51 = vadd.f32 %v4971_v12, %v1753_v58  ;;  %v1751_v19 = vadd.f32 %v1708_v30, %v1273_v31  ;;  %v2790_v58 = vor.u32 %v2789_v20, %v1892_v4  ;;  %v1906_v30 = vshrl.u32 %v5191_v49, 16 }
 0x209   : > { %v3982_v61 = vpop.f32.mrf.mxu0  ;;  %2201 = vrot.lane.b32.xlu1 %v5262_v55, %s4196_s25  ;;  %2195 = vrot.lane.b32.xlu0 %v5253_v41, %s4196_s25  ;;  %v2792_v47 = vor.u32 %v2791_v13, %v1899_v8 }
 0x20a   : > { %v1754_v54 = vadd.f32 %v3982_v61, %v1284_v23  ;;  %v1824_v63 = vmax.f32 %v1792_v51, 0.0  ;;  %v1790_v10 = vadd.f32 %v4971_v12, %v1751_v19  ;;  %v5305_v23 = vsel %vm4419_vm6, %v2790_v58, 0 }
 0x20b   : > { %v1711_v32 = vpop.f32.mrf.mxu0  ;;  %5905 = vst [vmem:[#allocation3_spill] sm:$0xff] %v5305_v23  ;;  %v1913_v61 = vshrl.u32 %v5253_v41, 16  ;;  %v1909_v19 = vshll.u32 %v5191_v49, 16  ;;  %v5322_v8 = vsel %vm4419_vm6, %v2792_v47, 0  ;;  %v1920_v58 = vshrl.u32 %v5230_v27, 16 }
 0x20c   : > { %v1793_v0 = vadd.f32 %v4971_v12, %v1754_v54  ;;  %v1752_v21 = vadd.f32 %v1711_v32, %v1276_v29  ;;  %v1822_v15 = vmax.f32 %v1790_v10, 0.0  ;;  %v1908_v29 = vrot.slane %v1906_v30, 7  ;;  %5906 = vst [vmem:[#allocation4_spill] sm:$0xff] %v5322_v8 }
 0x20d   : > { %2229 = vrot.lane.b32.xlu1 %v5272_v25, %s4195_s20  ;;  %2231 = vrot.lane.b32.xlu0 %v5262_v55, %s4195_s20 }
 0x20e   : > { %v1825_v39 = vmax.f32 %v1793_v0, 0.0  ;;  %v1791_v57 = vadd.f32 %v4971_v12, %v1752_v21  ;;  %v1911_v32 = vor.u32 %v1909_v19, %v1908_v29  ;;  %v1915_v0 = vrot.slane %v1913_v61, 7 }
 0x210   : > { %v5281_v36 = vpack.c.bf16 %v1825_v39, %v1824_v63  ;;  %v1823_v46 = vmax.f32 %v1791_v57, 0.0  ;;  %v1916_v63 = vshll.u32 %v5253_v41, 16  ;;  %v2793_v39 = vrot.slane %v1909_v19, 1 }
 0x211   : > { %2199 = vrot.lane.b32.xlu0 %v5272_v25, %s4196_s25  ;;  %v5333_v57 = vsel %vm4394_vm3, 0, %v1911_v32 }
 0x212   : > { %3859 = vmatprep.subr.bf16.mxu0 %v5281_v36  ;;  %2205 = vrot.lane.b32.xlu1 %v5281_v36, %s4196_s25  ;;  %v5292_v12 = vpack.c.bf16 %v1823_v46, %v1822_v15  ;;  %v1918_v46 = vor.u32 %v1916_v63, %v1915_v0 }
 0x213   : > { %v2208_v42 = vpop.permute.xlu0 %2207  ;;  %v2178_v14 = vpop.permute.xlu1 %2177 }
 0x214   : > { %v5344_v13 = vsel %vm4394_vm3, 0, %v1918_v46 }
 0x215   : > { %2235 = vrot.lane.b32.xlu0 %v5281_v36, %s4195_s20 }
 0x216   : > { %2233 = vrot.lane.b32.xlu1 %v5292_v12, %s4195_s20 }
 0x217   : > { %v2176_v31 = vpop.permute.xlu0 %2175 }
 0x218   : > { %v2240_v4 = vsel %vm2066_vm11, 0, %v2176_v31  ;;  %v2795_v31 = vrot.slane %v1916_v63, 1  ;;  %v1927_v63 = vshrl.u32 %v5272_v25, 16 }
 0x219   : > { %v2272_v60 = vsel %vm2114_vm10, %v2240_v4, %v2208_v42  ;;  %2203 = vrot.lane.b32.xlu0 %v5292_v12, %s4196_s25  ;;  %v2794_v42 = vor.u32 %v2793_v39, %v1906_v30  ;;  %v2242_v4 = vsel %vm2066_vm11, %v4990_v22, %v2178_v14  ;;  %v4165_v39 = vld [vmem:[%s5891_s3 + $0x80] sm:$0xff]  }
 0x21a   : > { %2869 = vrot.lane.b32.xlu1 %v5305_v23, %s4196_s25  ;;  %v5316_v51 = vpop.permute.xlu1 %2004  ;;  %3995 = vmatprep.mubr.msk.bf16.mxu1 %vm2352_vm12, %v2272_v60  ;;  %v1922_v60 = vrot.slane %v1920_v58, 7  ;;  %v2796_v0 = vor.u32 %v2795_v31, %v1913_v61  ;;  %v1923_v61 = vshll.u32 %v5230_v27, 16 }
 0x21b   : > { %v2035_v54 = vpop.permute.xlu0 %2034  ;;  %v5354_v30 = vsel %vm4419_vm6, %v2794_v42, 0 }
 0x21c   : > { %5907 = vst [vmem:[#allocation5_spill] sm:$0xff] %v5354_v30 }
 0x21d   : > { %2899 = vrot.lane.b32.xlu0 %v5305_v23, %s4195_s20 }
 0x21e   : > { %2901 = vrot.lane.b32.xlu1 %v5322_v8, %s4195_s20  ;;  %v5328_v21 = vpop.permute.xlu1 %2857 }
 0x21f   : > { %v2888_v10 = vpop.permute.xlu0 %2887 }
 0x221   : > { %2018 = vrot.lane.b32.xlu0 %v5246_v6, %s4196_s25 }
 0x222   : > { %2020 = vrot.lane.b32.xlu1 %v5333_v57, %s4196_s25 }
 0x223   : > { %v5339_v20 = vpop.permute.xlu1 %2181  ;;  %v2212_v15 = vpop.permute.xlu0 %2211 }
 0x225   : > { %2050 = vrot.lane.b32.xlu0 %v5333_v57, %s4195_s20 }
 0x226   : > { %2052 = vrot.lane.b32.xlu1 %v5344_v13, %s4195_s20 }
 0x227   : > { %v2210_v47 = vpop.permute.xlu1 %2209  ;;  %v2003_v29 = vpop.permute.xlu0 %2002 }
 0x228   : > { %v2274_v19 = vsel %vm2114_vm10, %v2242_v4, %v2210_v47  ;;  %v2068_v32 = vsel %vm2066_vm11, %v4735_v56, %v2003_v29  ;;  %v5378_v4 = vsel %vm4419_vm6, %v2796_v0, 0  ;;  %v1929_v47 = vrot.slane %v1927_v63, 7  ;;  %v4166_v29 = vld [vmem:[%s5891_s3 + $0x78] sm:$0xff]  }
 0x229   : > { %3996 = vmatmul.mubr.msk.bf16.vlgmr.msra.gmra.mxu1 %vm2352_vm12, %v2274_v19  ;;  %v2116_v14 = vsel %vm2114_vm10, %v2068_v32, %v2035_v54  ;;  %2871 = vrot.lane.b32.xlu0 %v5322_v8, %s4196_s25  ;;  %v1925_v54 = vor.u32 %v1923_v61, %v1922_v60  ;;  %v2797_v8 = vrot.slane %v1923_v61, 1 }
 0x22a   : > { %2873 = vrot.lane.b32.xlu1 %v5354_v30, %s4196_s25  ;;  %4039 = vmatprep.mubr.msk.bf16.mxu0 %vm2352_vm12, %v2116_v14 }
 0x22b   : > { %v5371_v46 = vpop.permute.xlu1 %2008  ;;  %v2856_v42 = vpop.permute.xlu0 %2855  ;;  %4072 = vmatpush3.bf16.msra.mxu1 %v5137_v1  ;;  %v1930_v1 = vshll.u32 %v5272_v25, 16  ;;  %v5397_v14 = vsel %vm4394_vm3, 0, %v1925_v54 }
 0x22c   : > { %v2920_v31 = vsel %vm2066_vm11, %v4756_v59, %v2856_v42  ;;  %4073 = vmatprep.subr.bf16.mxu1 %v4165_v39  ;;  %5908 = vst [vmem:[#allocation6_spill] sm:$0xff] %v5397_v14 }
 0x22d   : > { %v5386_v19 = vsel %vm2114_vm10, %v2920_v31, %v2888_v10  ;;  %2903 = vrot.lane.b32.xlu0 %v5354_v30, %s4195_s20  ;;  %v1932_v42 = vor.u32 %v1930_v1, %v1929_v47  ;;  %v4167_v10 = vld [vmem:[%s5891_s3 + $0x70] sm:$0xff]   ;;  %v2798_v47 = vor.u32 %v2797_v8, %v1920_v58  ;;  %v1934_v30 = vshrl.u32 %v5262_v55, 16 }
 0x22e   : > { %2905 = vrot.lane.b32.xlu1 %v5378_v4, %s4195_s20  ;;  %v1937_v58 = vshll.u32 %v5262_v55, 16 }
 0x22f   : > { %v5391_v32 = vpop.permute.xlu1 %2861  ;;  %v2180_v60 = vpop.permute.xlu0 %2179  ;;  %4074 = vmatpush3.bf16.msra.mxu1 %v4165_v39  ;;  %v5412_v61 = vsel %vm4394_vm3, 0, %v1932_v42  ;;  %v5429_v42 = vsel %vm4419_vm6, %v2798_v47, 0  ;;  %v1936_v23 = vrot.slane %v1934_v30, 7 }
 0x230   : > { %v2244_v0 = vsel %vm2066_vm11, %v4985_v34, %v2180_v60  ;;  %4075 = vmatprep.subr.bf16.mxu1 %v4166_v29  ;;  %v2799_v60 = vrot.slane %v1930_v1, 1 }
 0x231   : > { %v2276_v31 = vsel %vm2114_vm10, %v2244_v0, %v2212_v15  ;;  %2022 = vrot.lane.b32.xlu0 %v5344_v13, %s4196_s25  ;;  %v4168_v15 = vld [vmem:[%s5891_s3 + $0x68] sm:$0xff]  }
 0x232   : > { %2024 = vrot.lane.b32.xlu1 %v5397_v14, %s4196_s25  ;;  %3999 = vmatprep.mubr.msk.bf16.mxu1 %vm2352_vm12, %v2276_v31  ;;  %v2800_v31 = vor.u32 %v2799_v60, %v1927_v63 }
 0x233   : > { %v5408_v39 = vpop.permute.xlu1 %2185  ;;  %v2039_v54 = vpop.permute.xlu0 %2038  ;;  %4076 = vmatpush3.bf16.msra.mxu1 %v4166_v29  ;;  %v2071_v29 = vsel %vm2066_vm11, %v5042_v17, %v5316_v51  ;;  %v2923_v17 = vsel %vm2066_vm11, %v5055_v44, %v5328_v21  ;;  %v2246_v44 = vsel %vm2066_vm11, %v5037_v2, %v5339_v20 }
 0x234   : > { %4077 = vmatprep.subr.bf16.mxu1 %v4167_v10  ;;  %v5449_v60 = vsel %vm4419_vm6, %v2800_v31, 0  ;;  %v1948_v31 = vshrl.u32 %v5281_v36, 16 }
 0x235   : > { %2054 = vrot.lane.b32.xlu0 %v5397_v14, %s4195_s20  ;;  %v4169_v14 = vld [vmem:[%s5891_s3 + $0x60] sm:$0xff]  }
 0x236   : > { %2056 = vrot.lane.b32.xlu1 %v5412_v61, %s4195_s20 }
 0x237   : > { %v2037_v0 = vpop.permute.xlu1 %2036  ;;  %v2892_v8 = vpop.permute.xlu0 %2891  ;;  %4078 = vmatpush3.bf16.msra.mxu1 %v4167_v10  ;;  %v2801_v10 = vrot.slane %v1937_v58, 1 }
 0x238   : > { %v2118_v1 = vsel %vm2114_vm10, %v2071_v29, %v2037_v0  ;;  %4079 = vmatprep.subr.bf16.mxu1 %v4168_v15  ;;  %v1939_v29 = vor.u32 %v1937_v58, %v1936_v23 }
 0x239   : > { %4040 = vmatmul.mubr.msk.bf16.vlgmr.msra.gmra.mxu0 %vm2352_vm12, %v2118_v1  ;;  %2875 = vrot.lane.b32.xlu0 %v5378_v4, %s4196_s25  ;;  %v2802_v0 = vor.u32 %v2801_v10, %v1934_v30 }
 0x23a   : > { %2877 = vrot.lane.b32.xlu1 %v5429_v42, %s4196_s25  ;;  %3860 = vmatpush3.bf16.msra.mxu0 %v5131_v53  ;;  %v5465_v1 = vsel %vm4394_vm3, 0, %v1939_v29 }
 0x23b   : > { %3861 = vmatprep.subr.bf16.mxu0 %v5292_v12  ;;  %v2890_v51 = vpop.permute.xlu1 %2889  ;;  %v2216_v63 = vpop.permute.xlu0 %2215  ;;  %4080 = vmatpush3.bf16.msra.mxu1 %v4168_v15 }
 0x23c   : > { %v5445_v47 = vsel %vm2114_vm10, %v2923_v17, %v2890_v51  ;;  %4081 = vmatprep.subr.bf16.mxu1 %v4169_v14  ;;  %v5483_v17 = vsel %vm4419_vm6, %v2802_v0, 0  ;;  %v1941_v51 = vshrl.u32 %v5292_v12, 16 }
 0x23d   : > { %2907 = vrot.lane.b32.xlu0 %v5429_v42, %s4195_s20 }
 0x23e   : > { %2909 = vrot.lane.b32.xlu1 %v5449_v60, %s4195_s20  ;;  %3862 = vmatpush3.bf16.msra.mxu0 %v5156_v37  ;;  %v1943_v0 = vrot.slane %v1941_v51, 7 }
 0x23f   : > { %3863 = vmatprep.subr.bf16.mxu0 %v5262_v55  ;;  %v2214_v21 = vpop.permute.xlu1 %2213  ;;  %v2007_v15 = vpop.permute.xlu0 %2006  ;;  %4082 = vmatpush3.bf16.msra.mxu1 %v4169_v14 }
 0x240   : > { %v2278_v23 = vsel %vm2114_vm10, %v2246_v44, %v2214_v21  ;;  %v2074_v58 = vsel %vm2066_vm11, %v5008_v50, %v2007_v15 }
 0x241   : > { %4000 = vmatmul.mubr.msk.bf16.gmra.mxu1 %vm2352_vm12, %v2278_v23  ;;  %v2120_v20 = vsel %vm2114_vm10, %v2074_v58, %v2039_v54  ;;  %2026 = vrot.lane.b32.xlu0 %v5412_v61, %s4196_s25  ;;  %v1950_v54 = vrot.slane %v1948_v31, 7 }
 0x242   : > { %2028 = vrot.lane.b32.xlu1 %v5465_v1, %s4196_s25  ;;  %3864 = vmatpush3.bf16.msra.mxu0 %v5075_v26 }
 0x243   : > { %4043 = vmatprep.mubr.msk.bf16.mxu0 %vm2352_vm12, %v2120_v20  ;;  %3865 = vmatprep.subr.bf16.mxu0 %v5272_v25  ;;  %v5477_v50 = vpop.permute.xlu1 %2012  ;;  %v2860_v30 = vpop.permute.xlu0 %2859 }
 0x244   : > { %v2926_v14 = vsel %vm2066_vm11, %v5020_v40, %v2860_v30  ;;  %v1951_v40 = vshll.u32 %v5281_v36, 16 }
 0x245   : > { %v5489_v10 = vsel %vm2114_vm10, %v2926_v14, %v2892_v8  ;;  %2058 = vrot.lane.b32.xlu0 %v5465_v1, %s4195_s20  ;;  %v1944_v8 = vshll.u32 %v5292_v12, 16 }
 0x246   : > { %2881 = vrot.lane.b32.xlu1 %v5483_v17, %s4196_s25  ;;  %3866 = vmatpush3.bf16.msra.mxu0 %v5102_v35  ;;  %v1953_v15 = vor.u32 %v1951_v40, %v1950_v54 }
 0x247   : > { %3867 = vmatprep.subr.bf16.mxu0 %v5230_v27  ;;  %v5496_v29 = vpop.permute.xlu1 %2865  ;;  %v2184_v44 = vpop.permute.xlu0 %2183  ;;  %v1946_v30 = vor.u32 %v1944_v8, %v1943_v0  ;;  %v2803_v14 = vrot.slane %v1944_v8, 1 }
 0x248   : > { %v2248_v21 = vsel %vm2066_vm11, %v5029_v16, %v2184_v44  ;;  %v1985_v20 = vsel %vm4394_vm3, 0, %v1953_v15  ;;  %v2805_v15 = vrot.slane %v1951_v40, 1 }
 0x249   : > { %v2280_v23 = vsel %vm2114_vm10, %v2248_v21, %v2216_v63  ;;  %2879 = vrot.lane.b32.xlu0 %v5449_v60, %s4196_s25  ;;  %v5522_v44 = vsel %vm4394_vm3, 0, %v1946_v30  ;;  %v2804_v21 = vor.u32 %v2803_v14, %v1941_v51  ;;  %vm3474_vm3 = vcmask 0  }
 0x24a   : > { %2064 = vrot.lane.b32.xlu1 %v4735_v56, %s4195_s20  ;;  %3868 = vmatpush3.bf16.msra.mxu0 %v5029_v16  ;;  %v2077_v56 = vsel %vm2066_vm11, %v5084_v43, %v5371_v46  ;;  %v2806_v40 = vor.u32 %v2805_v15, %v1948_v31 }
 0x24b   : > { %4003 = vmatprep.mubr.msk.bf16.mxu1 %vm2352_vm12, %v2280_v23  ;;  %3869 = vmatprep.subr.bf16.mxu0 %v5253_v41  ;;  %v2190_v36 = vpop.permute.xlu1 %2189  ;;  %v2043_v58 = vpop.permute.xlu0 %2042  ;;  %v5538_v51 = vsel %vm4419_vm6, %v2804_v21, 0 }
 0x24c   : > { %v2838_v31 = vsel %vm4419_vm6, %v2806_v40, 0  ;;  %v2254_v21 = vsel %vm2066_vm11, %v5156_v37, %v2190_v36 }
 0x24d   : > { %2911 = vrot.lane.b32.xlu0 %v5483_v17, %s4195_s20 }
 0x24e   : > { %2032 = vrot.lane.b32.xlu1 %v1985_v20, %s4196_s25  ;;  %3870 = vmatpush3.bf16.msra.mxu0 %v5037_v2  ;;  %v2929_v2 = vsel %vm2066_vm11, %v5094_v28, %v5391_v32 }
 0x24f   : > { %3871 = vmatprep.subr.bf16.mxu0 %v5191_v49  ;;  %v2041_v16 = vpop.permute.xlu1 %2040  ;;  %v2896_v63 = vpop.permute.xlu0 %2895 }
 0x250   : > { %v2122_v54 = vsel %vm2114_vm10, %v2077_v56, %v2041_v16  ;;  %v2935_v16 = vsel %vm2066_vm11, %v5160_v62, %v5496_v29 }
 0x251   : > { %4044 = vmatmul.mubr.msk.bf16.gmra.mxu0 %vm2352_vm12, %v2122_v54  ;;  %2062 = vrot.lane.b32.xlu0 %v1985_v20, %s4195_s20 }
 0x252   : > { %2060 = vrot.lane.b32.xlu1 %v5522_v44, %s4195_s20  ;;  %3872 = vmatpush3.bf16.msra.mxu0 %v4985_v34  ;;  %v2250_v34 = vsel %vm2066_vm11, %v5102_v35, %v5408_v39 }
 0x253   : > { %3873 = vmatprep.subr.bf16.mxu0 %v5199_v11  ;;  %v2894_v33 = vpop.permute.xlu1 %2893  ;;  %v2220_v43 = vpop.permute.xlu0 %2219 }
 0x254   : > { %v5534_v46 = vsel %vm2114_vm10, %v2929_v2, %v2894_v33 }
 0x255   : > { %2030 = vrot.lane.b32.xlu0 %v5522_v44, %s4196_s25 }
 0x256   : > { %2913 = vrot.lane.b32.xlu1 %v5538_v51, %s4195_s20  ;;  %3874 = vmatpush3.bf16.msra.mxu0 %v4990_v22 }
 0x257   : > { %v2218_v28 = vpop.permute.xlu1 %2217  ;;  %v2011_v32 = vpop.permute.xlu0 %2010 }
 0x258   : > { %v2282_v0 = vsel %vm2114_vm10, %v2250_v34, %v2218_v28  ;;  %v2080_v8 = vsel %vm2066_vm11, %v5051_v18, %v2011_v32 }
 0x259   : > { %4004 = vmatmul.mubr.msk.bf16.gmra.mxu1 %vm2352_vm12, %v2282_v0  ;;  %v2124_v22 = vsel %vm2114_vm10, %v2080_v8, %v2043_v58  ;;  %2883 = vrot.lane.b32.xlu0 %v5538_v51, %s4196_s25 }
 0x25a   : > { %2885 = vrot.lane.b32.xlu1 %v2838_v31, %s4196_s25  ;;  %4047 = vmatprep.mubr.msk.bf16.mxu0 %vm2352_vm12, %v2124_v22 }
 0x25b   : > { %v2017_v35 = vpop.permute.xlu1 %2016  ;;  %v2864_v39 = vpop.permute.xlu0 %2863 }
 0x25c   : > { %v2932_v23 = vsel %vm2066_vm11, %v5066_v7, %v2864_v39  ;;  %v2083_v7 = vsel %vm2066_vm11, %v5147_v48, %v5477_v50 }
 0x25d   : > { %v5564_v45 = vsel %vm2114_vm10, %v2932_v23, %v2896_v63  ;;  %2915 = vrot.lane.b32.xlu0 %v2838_v31, %s4195_s20 }
 0x25e   : > { %2917 = vrot.lane.b32.xlu1 %v4756_v59, %s4195_s20 }
 0x25f   : > { %v2194_v18 = vpop.permute.xlu1 %2193  ;;  %v2188_v58 = vpop.permute.xlu0 %2187 }
 0x260   : > { %v2252_v20 = vsel %vm2066_vm11, %v5075_v26, %v2188_v58  ;;  %v2258_v28 = vsel %vm2066_vm11, %v5199_v11, %v2194_v18 }
 0x261   : > { %v2284_v30 = vsel %vm2114_vm10, %v2252_v20, %v2220_v43  ;;  %v2089_v43 = vsel %vm2066_vm11, %v5203_v9, %v2017_v35 }
 0x262   : > { %4007 = vmatprep.mubr.msk.bf16.mxu1 %vm2352_vm12, %v2284_v30 }
 0x263   : > { %v2045_v14 = vpop.permute.xlu1 %2044  ;;  %v2047_v59 = vpop.permute.xlu0 %2046 }
 0x264   : > { %v2126_v56 = vsel %vm2114_vm10, %v2083_v7, %v2045_v14 }
 0x265   : > { %4048 = vmatmul.mubr.msk.bf16.gmra.mxu0 %vm2352_vm12, %v2126_v56 }
 0x267   : > { %v2898_v63 = vpop.permute.xlu1 %2897  ;;  %v2224_v26 = vpop.permute.xlu0 %2223 }
 0x268   : > { %v5580_v54 = vsel %vm2114_vm10, %v2935_v16, %v2898_v63 }
 0x26b   : > { %v2222_v15 = vpop.permute.xlu1 %2221  ;;  %v2015_v48 = vpop.permute.xlu0 %2014 }
 0x26c   : > { %v2286_v50 = vsel %vm2114_vm10, %v2254_v21, %v2222_v15  ;;  %v2086_v2 = vsel %vm2066_vm11, %v5112_v38, %v2015_v48 }
 0x26d   : > { %4008 = vmatmul.mubr.msk.bf16.gmra.mxu1 %vm2352_vm12, %v2286_v50  ;;  %v2128_v33 = vsel %vm2114_vm10, %v2086_v2, %v2047_v59 }
 0x26e   : > { %4051 = vmatprep.mubr.msk.bf16.mxu0 %vm2352_vm12, %v2128_v33 }
 0x26f   : > { %v2198_v62 = vpop.permute.xlu1 %2197  ;;  %v5590_v29 = vpop.permute.xlu0 %2867 }
 0x270   : > { %v2262_v35 = vsel %vm2066_vm11, %v5253_v41, %v2198_v62 }
 0x273   : > { %v2049_v37 = vpop.permute.xlu1 %2048  ;;  %v2192_v36 = vpop.permute.xlu0 %2191 }
 0x274   : > { %v2130_v40 = vsel %vm2114_vm10, %v2089_v43, %v2049_v37  ;;  %v2256_v34 = vsel %vm2066_vm11, %v5131_v53, %v2192_v36 }
 0x275   : > { %4052 = vmatmul.mubr.msk.bf16.gmra.mxu0 %vm2352_vm12, %v2130_v40  ;;  %v2288_v38 = vsel %vm2114_vm10, %v2256_v34, %v2224_v26 }
 0x276   : > { %4011 = vmatprep.mubr.msk.bf16.mxu1 %vm2352_vm12, %v2288_v38 }
 0x277   : > { %v2226_v32 = vpop.permute.xlu1 %2225  ;;  %v2228_v0 = vpop.permute.xlu0 %2227 }
 0x278   : > { %v2290_v9 = vsel %vm2114_vm10, %v2258_v28, %v2226_v32  ;;  %v5909_v32 = vld [vmem:[#allocation3_spill] sm:$0xff] }
 0x279   : > { %4012 = vmatmul.mubr.msk.bf16.gmra.mxu1 %vm2352_vm12, %v2290_v9 }
 0x27b   : > { %v2202_v8 = vpop.permute.xlu1 %2201  ;;  %v2196_v31 = vpop.permute.xlu0 %2195 }
 0x27c   : > { %v2260_v53 = vsel %vm2066_vm11, %v5191_v49, %v2196_v31  ;;  %v2266_v30 = vsel %vm2066_vm11, %v5272_v25, %v2202_v8 }
 0x27d   : > { %v2292_v22 = vsel %vm2114_vm10, %v2260_v53, %v2228_v0  ;;  %v5910_v53 = vld [vmem:[#allocation4_spill] sm:$0xff] }
 0x27e   : > { %4015 = vmatprep.mubr.msk.bf16.mxu1 %vm2352_vm12, %v2292_v22 }
 0x27f   : > { %v2230_v39 = vpop.permute.xlu1 %2229  ;;  %v2232_v11 = vpop.permute.xlu0 %2231 }
 0x280   : > { %v2294_v23 = vsel %vm2114_vm10, %v2262_v35, %v2230_v39  ;;  %v5911_v39 = vld [vmem:[#allocation5_spill] sm:$0xff] }
 0x281   : > { %4016 = vmatmul.mubr.msk.bf16.gmra.mxu1 %vm2352_vm12, %v2294_v23  ;;  %v5912_v23 = vld [vmem:[#allocation6_spill] sm:$0xff] }
 0x283   : > { %v2200_v58 = vpop.permute.xlu0 %2199 }
 0x284   : > { %v2206_v18 = vpop.permute.xlu1 %2205  ;;  %v2264_v20 = vsel %vm2066_vm11, %v5230_v27, %v2200_v58 }
 0x285   : > { %v2296_v49 = vsel %vm2114_vm10, %v2264_v20, %v2232_v11  ;;  %v2270_v16 = vsel %vm2066_vm11, %v5292_v12, %v2206_v18 }
 0x286   : > { %4019 = vmatprep.mubr.msk.bf16.mxu1 %vm2352_vm12, %v2296_v49  ;;  %v2302_v21 = vsel %vm2114_vm10, %v2270_v16, %v5285_v5 }
 0x287   : > { %v2236_v14 = vpop.permute.xlu0 %2235 }
 0x288   : > { %v2234_v7 = vpop.permute.xlu1 %2233 }
 0x289   : > { %v2298_v41 = vsel %vm2114_vm10, %v2266_v30, %v2234_v7 }
 0x28a   : > { %4020 = vmatmul.mubr.msk.bf16.gmra.mxu1 %vm2352_vm12, %v2298_v41 }
 0x28b   : > { %v2204_v56 = vpop.permute.xlu0 %2203 }
 0x28c   : > { %v2870_v59 = vpop.permute.xlu1 %2869  ;;  %v2268_v27 = vsel %vm2066_vm11, %v5262_v55, %v2204_v56 }
 0x28d   : > { %v2300_v63 = vsel %vm2114_vm10, %v2268_v27, %v2236_v14 }
 0x28e   : > { %4023 = vmatprep.mubr.msk.bf16.mxu1 %vm2352_vm12, %v2300_v63 }
 0x28f   : > { %v2900_v26 = vpop.permute.xlu0 %2899 }
 0x290   : > { %v2902_v25 = vpop.permute.xlu1 %2901 }
 0x292   : > { %4024 = vmatmul.mubr.msk.bf16.gmra.mxu1 %vm2352_vm12, %v2302_v21 }
 0x293   : > { %4083 = vmatprep.mubr.msk.bf16.mxu1 %vm2352_vm12, %v5386_v19  ;;  %v2019_v48 = vpop.permute.xlu0 %2018 }
 0x294   : > { %v2021_v15 = vpop.permute.xlu1 %2020  ;;  %v2092_v50 = vsel %vm2066_vm11, %v5183_v52, %v2019_v48 }
 0x295   : > { %v2095_v12 = vsel %vm2066_vm11, %v5246_v6, %v2021_v15 }
 0x297   : > { %v2051_v33 = vpop.permute.xlu0 %2050 }
 0x298   : > { %v2053_v55 = vpop.permute.xlu1 %2052  ;;  %v2132_v62 = vsel %vm2114_vm10, %v2092_v50, %v2051_v33 }
 0x299   : > { %v2134_v2 = vsel %vm2114_vm10, %v2095_v12, %v2053_v55  ;;  %4055 = vmatprep.mubr.msk.bf16.mxu0 %vm2352_vm12, %v2132_v62 }
 0x29a   : > { %4084 = vmatmul.mubr.msk.bf16.vlgmr.msra.gmra.mxu1 %vm2352_vm12, %v5445_v47  ;;  %4056 = vmatmul.mubr.msk.bf16.gmra.mxu0 %vm2352_vm12, %v2134_v2 }
 0x29b   : > { %4087 = vmatprep.mubr.msk.bf16.mxu1 %vm2352_vm12, %v5489_v10  ;;  %v2872_v5 = vpop.permute.xlu0 %2871  ;;  %v2938_v10 = vsel %vm2066_vm11, %v5124_v3, %v5590_v29 }
 0x29c   : > { %v2874_v6 = vpop.permute.xlu1 %2873  ;;  %v2944_v0 = vsel %vm2066_vm11, %v5909_v32, %v2872_v5 }
 0x29d   : > { %v2947_v22 = vsel %vm2066_vm11, %v5910_v53, %v2874_v6 }
 0x29f   : > { %v2904_v43 = vpop.permute.xlu0 %2903 }
 0x2a0   : > { %v2906_v19 = vpop.permute.xlu1 %2905 }
 0x2a2   : > { %4088 = vmatmul.mubr.msk.bf16.gmra.mxu1 %vm2352_vm12, %v5534_v46  ;;  %v2979_v46 = vsel %vm2114_vm10, %v2938_v10, %v2900_v26 }
 0x2a3   : > { %4091 = vmatprep.mubr.msk.bf16.mxu1 %vm2352_vm12, %v5564_v45  ;;  %v2023_v37 = vpop.permute.xlu0 %2022 }
 0x2a4   : > { %v2025_v52 = vpop.permute.xlu1 %2024  ;;  %v2098_v40 = vsel %vm2066_vm11, %v5333_v57, %v2023_v37  ;;  %v2941_v57 = vsel %vm2066_vm11, %v5212_v24, %v2870_v59  ;;  %v2985_v24 = vsel %vm2114_vm10, %v2947_v22, %v2906_v19 }
 0x2a5   : > { %v2101_v47 = vsel %vm2066_vm11, %v5344_v13, %v2025_v52  ;;  %v2981_v28 = vsel %vm2114_vm10, %v2941_v57, %v2902_v25 }
 0x2a7   : > { %v2055_v38 = vpop.permute.xlu0 %2054 }
 0x2a8   : > { %v2057_v36 = vpop.permute.xlu1 %2056  ;;  %v2136_v45 = vsel %vm2114_vm10, %v2098_v40, %v2055_v38 }
 0x2a9   : > { %v2138_v34 = vsel %vm2114_vm10, %v2101_v47, %v2057_v36  ;;  %4059 = vmatprep.mubr.msk.bf16.mxu0 %vm2352_vm12, %v2136_v45 }
 0x2aa   : > { %4092 = vmatmul.mubr.msk.bf16.gmra.mxu1 %vm2352_vm12, %v5580_v54  ;;  %4060 = vmatmul.mubr.msk.bf16.gmra.mxu0 %vm2352_vm12, %v2138_v34  ;;  %v2983_v54 = vsel %vm2114_vm10, %v2944_v0, %v2904_v43 }
 0x2ab   : > { %4095 = vmatprep.mubr.msk.bf16.mxu1 %vm2352_vm12, %v2979_v46  ;;  %v2876_v13 = vpop.permute.xlu0 %2875 }
 0x2ac   : > { %v2878_v3 = vpop.permute.xlu1 %2877  ;;  %v2950_v11 = vsel %vm2066_vm11, %v5911_v39, %v2876_v13 }
 0x2ad   : > { %v2953_v41 = vsel %vm2066_vm11, %v5378_v4, %v2878_v3 }
 0x2af   : > { %v2908_v9 = vpop.permute.xlu0 %2907 }
 0x2b0   : > { %v2910_v29 = vpop.permute.xlu1 %2909  ;;  %v2987_v20 = vsel %vm2114_vm10, %v2950_v11, %v2908_v9 }
 0x2b1   : > { %v2989_v59 = vsel %vm2114_vm10, %v2953_v41, %v2910_v29 }
 0x2b2   : > { %4096 = vmatmul.mubr.msk.bf16.gmra.mxu1 %vm2352_vm12, %v2981_v28 }
 0x2b3   : > { %4099 = vmatprep.mubr.msk.bf16.mxu1 %vm2352_vm12, %v2983_v54  ;;  %v2027_v31 = vpop.permute.xlu0 %2026 }
 0x2b4   : > { %v2029_v8 = vpop.permute.xlu1 %2028  ;;  %v2104_v18 = vsel %vm2066_vm11, %v5912_v23, %v2027_v31 }
 0x2b5   : > { %v2107_v63 = vsel %vm2066_vm11, %v5412_v61, %v2029_v8 }
 0x2b7   : > { %v2059_v58 = vpop.permute.xlu0 %2058 }
 0x2b8   : > { %v2882_v35 = vpop.permute.xlu1 %2881  ;;  %v2140_v49 = vsel %vm2114_vm10, %v2104_v18, %v2059_v58 }
 0x2b9   : > { %4063 = vmatprep.mubr.msk.bf16.mxu0 %vm2352_vm12, %v2140_v49  ;;  %v2959_v21 = vsel %vm2066_vm11, %v5449_v60, %v2882_v35 }
 0x2ba   : > { %4100 = vmatmul.mubr.msk.bf16.gmra.mxu1 %vm2352_vm12, %v2985_v24 }
 0x2bb   : > { %4103 = vmatprep.mubr.msk.bf16.mxu1 %vm2352_vm12, %v2987_v20  ;;  %v2880_v7 = vpop.permute.xlu0 %2879 }
 0x2bc   : > { %v2065_v30 = vpop.permute.xlu1 %2064  ;;  %v2956_v56 = vsel %vm2066_vm11, %v5429_v42, %v2880_v7 }
 0x2bf   : > { %v2912_v16 = vpop.permute.xlu0 %2911 }
 0x2c0   : > { %v2033_v14 = vpop.permute.xlu1 %2032  ;;  %v2991_v27 = vsel %vm2114_vm10, %v2956_v56, %v2912_v16 }
 0x2c1   : > { %v2113_v12 = vsel %vm2066_vm11, %v5522_v44, %v2033_v14 }
 0x2c2   : > { %4104 = vmatmul.mubr.msk.bf16.gmra.mxu1 %vm2352_vm12, %v2989_v59  ;;  %v2146_v60 = vsel %vm2114_vm10, %v2113_v12, %v2065_v30 }
 0x2c3   : > { %4107 = vmatprep.mubr.msk.bf16.mxu1 %vm2352_vm12, %v2991_v27  ;;  %v2063_v4 = vpop.permute.xlu0 %2062 }
 0x2c4   : > { %v2061_v25 = vpop.permute.xlu1 %2060 }
 0x2c5   : > { %v2142_v26 = vsel %vm2114_vm10, %v2107_v63, %v2061_v25 }
 0x2c6   : > { %4064 = vmatmul.mubr.msk.bf16.gmra.mxu0 %vm2352_vm12, %v2142_v26 }
 0x2c7   : > { %v2031_v48 = vpop.permute.xlu0 %2030 }
 0x2c8   : > { %v2914_v42 = vpop.permute.xlu1 %2913  ;;  %v2110_v55 = vsel %vm2066_vm11, %v5465_v1, %v2031_v48 }
 0x2c9   : > { %v2993_v15 = vsel %vm2114_vm10, %v2959_v21, %v2914_v42  ;;  %v2144_v61 = vsel %vm2114_vm10, %v2110_v55, %v2063_v4  ;;  %v5781_v42 = vld [vmem:[%s5892_s4] ss:$0 sm:$0xff] }
 0x2ca   : > { %4108 = vmatmul.mubr.msk.bf16.gmra.mxu1 %vm2352_vm12, %v2993_v15  ;;  %4067 = vmatprep.mubr.msk.bf16.mxu0 %vm2352_vm12, %v2144_v61 }
 0x2cb   : > { %v2884_v2 = vpop.permute.xlu0 %2883 }
 0x2cc   : > { %v2886_v50 = vpop.permute.xlu1 %2885  ;;  %v2962_v44 = vsel %vm2066_vm11, %v5483_v17, %v2884_v2 }
 0x2cd   : > { %v2965_v33 = vsel %vm2066_vm11, %v5538_v51, %v2886_v50 }
 0x2ce   : > { %4068 = vmatmul.mubr.msk.bf16.gmra.mxu0 %vm2352_vm12, %v2146_v60 }
 0x2cf   : > { %v2916_v6 = vpop.permute.xlu0 %2915 }
 0x2d0   : > { %v2918_v62 = vpop.permute.xlu1 %2917  ;;  %v2995_v5 = vsel %vm2114_vm10, %v2962_v44, %v2916_v6 }
 0x2d1   : > { %v2997_v1 = vsel %vm2114_vm10, %v2965_v33, %v2918_v62  ;;  %4111 = vmatprep.mubr.msk.bf16.mxu1 %vm2352_vm12, %v2995_v5 }
 0x2d2   : > { %4112 = vmatmul.mubr.msk.bf16.gmra.mxu1 %vm2352_vm12, %v2997_v1 }
 0x2e9   : > { %v3997_v19 = vpop.f32.mrf.mxu1 }
 0x2eb   : > { %v2419_v43 = vpop.f32.mrf.mxu1 }
 0x2ed   : > { %v3998_v52 = vpop.f32.mrf.mxu1 }
 0x2ef   : > { %v2422_v37 = vpop.f32.mrf.mxu1 }
 0x2f9   : > { %v4041_v3 = vpop.f32.mrf.mxu0 }
 0x2fa   : > { %v2657_v50 = vadd.f32 %v4041_v3, %v3997_v19 }
 0x2fb   : > { %v2648_v57 = vpop.f32.mrf.mxu0 }
 0x2fc   : > { %v2649_v25 = vadd.f32 %v2648_v57, %v2419_v43 }
 0x2fd   : > { %v4042_v28 = vpop.f32.mrf.mxu0 }
 0x2fe   : > { %v2660_v6 = vadd.f32 %v4042_v28, %v3998_v52 }
 0x2ff   : > { %v2651_v9 = vpop.f32.mrf.mxu0 }
 0x300   : > { %v2652_v48 = vadd.f32 %v2651_v9, %v2422_v37 }
 0x301   : > { %v5714_v47 = vpop.f32.mrf.mxu1 }
 0x303   : > { %v5716_v51 = vpop.f32.mrf.mxu1 }
 0x305   : > { %v5718_v36 = vpop.f32.mrf.mxu1 }
 0x307   : > { %v5720_v17 = vpop.f32.mrf.mxu1 }
 0x311   : > { %v4045_v8 = vpop.f32.mrf.mxu0 }
 0x313   : > { %v2664_v22 = vpop.f32.mrf.mxu0 }
 0x314   : > { %v2665_v19 = vadd.f32 %v2664_v22, %v5716_v51 }
 0x315   : > { %v4046_v39 = vpop.f32.mrf.mxu0 }
 0x317   : > { %v2667_v18 = vpop.f32.mrf.mxu0 }
 0x319   : > { %v5722_v10 = vpop.f32.mrf.mxu1 }
 0x31b   : > { %v5724_v40 = vpop.f32.mrf.mxu1 }
 0x31d   : > { %v5726_v34 = vpop.f32.mrf.mxu1 }
 0x31f   : > { %v5728_v38 = vpop.f32.mrf.mxu1 }
 0x325   : > { %v5758_v20 = vpop.f32.mrf.mxu0 }
 0x327   : > { %v2680_v7 = vpop.f32.mrf.mxu0 }
 0x329   : > { %v5768_v59 = vpop.f32.mrf.mxu0 }
 0x32b   : > { %v5774_v27 = vpop.f32.mrf.mxu0 }
 0x32d   : > { %v5730_v46 = vpop.f32.mrf.mxu1 }
 0x32f   : > { %v5732_v45 = vpop.f32.mrf.mxu1 }
 0x331   : > { %v5734_v13 = vpop.f32.mrf.mxu1 }
 0x333   : > { %v5736_v29 = vpop.f32.mrf.mxu1 }
 0x335   : > { %v5776_v26 = vpop.f32.mrf.mxu0 }
 0x337   : > { %v5784_v55 = vpop.f32.mrf.mxu0 }
 0x339   : > { %v5738_v32 = vpop.f32.mrf.mxu1  ;;  %v5787_v44 = vpop.f32.mrf.mxu0 }
 0x33b   : > { %v5740_v0 = vpop.f32.mrf.mxu1  ;;  %v5790_v57 = vpop.f32.mrf.mxu0 }
 0x33d   : > { %v5742_v54 = vpop.f32.mrf.mxu1 }
 0x33f   : > { %v5744_v31 = vpop.f32.mrf.mxu1 }
 0x341   : > { %v5746_v53 = vpop.f32.mrf.mxu1 }
 0x343   : > { %v5748_v35 = vpop.f32.mrf.mxu1 }
 0x345   : > { %v5750_v24 = vpop.f32.mrf.mxu1 }
 0x347   : > { %v5752_v11 = vpop.f32.mrf.mxu1 }
 0x34a   : > { %v5754_v23 = vpop.f32.mrf.mxu1 }
 0x34c   : > { %v5756_v58 = vpop.f32.mrf.mxu1 }
 0x34e   : > { %v5760_v49 = vpop.f32.mrf.mxu1 }
 0x350   : > { %v5762_v30 = vpop.f32.mrf.mxu1 }
 0x352   : > { %v5764_v41 = vpop.f32.mrf.mxu1 }
 0x354   : > { %v5766_v14 = vpop.f32.mrf.mxu1 }
 0x356   : > { %v5770_v56 = vpop.f32.mrf.mxu1 }
 0x358   : > { %v5772_v16 = vpop.f32.mrf.mxu1 }
 0x35a   : > { %v4085_v63 = vpop.f32.mrf.mxu1  ;;  %v4057_v3 = vpop.f32.mrf.mxu0 }
 0x35b   : > { %v3242_v33 = vadd.f32 %v4085_v63, %v2657_v50  ;;  %v2673_v50 = vadd.f32 %v4045_v8, %v5714_v47  ;;  %v2681_v8 = vadd.f32 %v2680_v7, %v5724_v40 }
 0x35c   : > { %v3113_v4 = vpop.f32.mrf.mxu1  ;;  %v2712_v52 = vpop.f32.mrf.mxu0 }
 0x35d   : > { %v3240_v21 = vadd.f32 %v3113_v4, %v2649_v25  ;;  %v3281_v43 = vadd.f32 %v5781_v42, %v3242_v33 }
 0x35e   : > { %v4086_v15 = vpop.f32.mrf.mxu1  ;;  %v4058_v51 = vpop.f32.mrf.mxu0 }
 0x35f   : > { %v3279_v12 = vadd.f32 %v5781_v42, %v3240_v21  ;;  %v3243_v37 = vadd.f32 %v4086_v15, %v2660_v6 }
 0x360   : > { %v3116_v61 = vpop.f32.mrf.mxu1 }
 0x361   : > { %v3241_v2 = vadd.f32 %v3116_v61, %v2652_v48  ;;  %3311 = vxpose.xlu1.b32.start [1/16] (narrow) %v3279_v12, 8  ;;  %v3282_v63 = vadd.f32 %v5781_v42, %v3243_v37  ;;  %v2668_v48 = vadd.f32 %v2667_v18, %v5720_v17  ;;  %v2715_v17 = vpop.f32.mrf.mxu0 }
 0x362   : > { %v4089_v60 = vpop.f32.mrf.mxu1 }
 0x363   : > { %v3280_v62 = vadd.f32 %v5781_v42, %v3241_v2  ;;  %v3246_v2 = vadd.f32 %v4089_v60, %v2673_v50 }
 0x364   : > { %v3129_v1 = vpop.f32.mrf.mxu1 }
 0x365   : > { %3312 = vxpose.xlu1.b32.cont [2/16] (narrow) %v3280_v62, 8  ;;  %v3244_v4 = vadd.f32 %v3129_v1, %v2665_v19  ;;  %v2676_v1 = vadd.f32 %v4046_v39, %v5718_v36  ;;  %v3285_v6 = vadd.f32 %v5781_v42, %v3246_v2 }
 0x366   : > { %v4090_v5 = vpop.f32.mrf.mxu1 }
 0x367   : > { %v3283_v12 = vadd.f32 %v5781_v42, %v3244_v4  ;;  %v2684_v4 = vadd.f32 %v5774_v27, %v5728_v38 }
 0x368   : > { %v3132_v9 = vpop.f32.mrf.mxu1 }
 0x369   : > { %3313 = vxpose.xlu1.b32.cont [3/16] (narrow) %v3281_v43, 8  ;;  %v3245_v15 = vadd.f32 %v3132_v9, %v2668_v48  ;;  %v3247_v43 = vadd.f32 %v4090_v5, %v2676_v1  ;;  %v2713_v9 = vadd.f32 %v2712_v52, %v5740_v0  ;;  %v2721_v52 = vadd.f32 %v4057_v3, %v5738_v32 }
 0x36a   : > { %v4093_v25 = vpop.f32.mrf.mxu1  ;;  %v5804_v37 = vpop.f32.mrf.mxu0 }
 0x36b   : > { %v3284_v33 = vadd.f32 %v5781_v42, %v3245_v15  ;;  %v3286_v19 = vadd.f32 %v5781_v42, %v3247_v43  ;;  %v2724_v43 = vadd.f32 %v4058_v51, %v5742_v54 }
 0x36c   : > { %v3145_v21 = vpop.f32.mrf.mxu1  ;;  %v2728_v39 = vpop.f32.mrf.mxu0 }
 0x36d   : > { %3314 = vxpose.xlu1.b32.cont [4/16] (narrow) %v3282_v63, 8  ;;  %v3248_v36 = vadd.f32 %v3145_v21, %v2681_v8  ;;  %v2689_v21 = vadd.f32 %v5758_v20, %v5722_v10 }
 0x36e   : > { %v4094_v28 = vpop.f32.mrf.mxu1  ;;  %v5816_v50 = vpop.f32.mrf.mxu0 }
 0x36f   : > { %v3287_v15 = vadd.f32 %v5781_v42, %v3248_v36  ;;  %v3250_v27 = vadd.f32 %v4093_v25, %v2689_v21 }
 0x370   : > { %v3148_v61 = vpop.f32.mrf.mxu1  ;;  %v2731_v1 = vpop.f32.mrf.mxu0 }
 0x371   : > { %3315 = vxpose.xlu1.b32.cont [5/16] (narrow) %v3283_v12, 8  ;;  %v2716_v12 = vadd.f32 %v2715_v17, %v5744_v31  ;;  %v3249_v40 = vadd.f32 %v3148_v61, %v2684_v4  ;;  %v3289_v20 = vadd.f32 %v5781_v42, %v3250_v27 }
 0x372   : > { %v5797_v22 = vpop.f32.mrf.mxu1 }
 0x373   : > { %v3288_v31 = vadd.f32 %v5781_v42, %v3249_v40 }
 0x374   : > { %v3161_v62 = vpop.f32.mrf.mxu1 }
 0x375   : > { %3316 = vxpose.xlu1.b32.cont [6/16] (narrow) %v3284_v33, 8 }
 0x376   : > { %v5801_v18 = vpop.f32.mrf.mxu1 }
 0x378   : > { %v5806_v47 = vpop.f32.mrf.mxu1 }
 0x379   : > { %3317 = vxpose.xlu1.b32.cont [7/16] (narrow) %v3285_v6, 8  ;;  %v2692_v6 = vadd.f32 %v5768_v59, %v5726_v34 }
 0x37a   : > { %v4101_v60 = vpop.f32.mrf.mxu1 }
 0x37b   : > { %v3258_v33 = vadd.f32 %v4101_v60, %v2721_v52  ;;  %v3251_v3 = vadd.f32 %v4094_v28, %v2692_v6  ;;  %v2697_v60 = vadd.f32 %v5784_v55, %v5732_v45  ;;  %v2700_v45 = vadd.f32 %v5790_v57, %v5736_v29 }
 0x37c   : > { %v3177_v63 = vpop.f32.mrf.mxu1  ;;  %v2737_v52 = vadd.f32 %v5804_v37, %v5746_v53  ;;  %v2708_v53 = vadd.f32 %v5787_v44, %v5734_v13  ;;  %v2740_v6 = vadd.f32 %v5816_v50, %v5750_v24 }
 0x37d   : > { %v3256_v48 = vadd.f32 %v3177_v63, %v2713_v9  ;;  %3318 = vxpose.xlu1.b32.cont [8/16] (narrow) %v3286_v19, 8  ;;  %v3297_v25 = vadd.f32 %v5781_v42, %v3258_v33  ;;  %v2729_v9 = vadd.f32 %v2728_v39, %v5748_v35  ;;  %v3252_v59 = vadd.f32 %v3161_v62, %v2697_v60 }
 0x37e   : > { %v4102_v5 = vpop.f32.mrf.mxu1  ;;  %v3290_v28 = vadd.f32 %v5781_v42, %v3251_v3  ;;  %v2732_v35 = vadd.f32 %v2731_v1, %v5752_v11  ;;  %v3253_v40 = vadd.f32 %v5806_v47, %v2700_v45 }
 0x37f   : > { %v3295_v7 = vadd.f32 %v5781_v42, %v3256_v48  ;;  %v3259_v8 = vadd.f32 %v4102_v5, %v2724_v43 }
 0x380   : > { %v3180_v0 = vpop.f32.mrf.mxu1  ;;  %v3292_v1 = vadd.f32 %v5781_v42, %v3253_v40 }
 0x381   : > { %v3257_v2 = vadd.f32 %v3180_v0, %v2716_v12  ;;  %3343 = vxpose.xlu0.b32.start [1/16] (narrow) %v3295_v7, 8  ;;  %3319 = vxpose.xlu1.b32.cont [9/16] (narrow) %v3287_v15, 8  ;;  %v3298_v4 = vadd.f32 %v5781_v42, %v3259_v8  ;;  %v3291_v15 = vadd.f32 %v5781_v42, %v3252_v59 }
 0x382   : > { %v4105_v38 = vpop.f32.mrf.mxu1 }
 0x383   : > { %v3296_v61 = vadd.f32 %v5781_v42, %v3257_v2 }
 0x384   : > { %v3193_v17 = vpop.f32.mrf.mxu1 }
 0x385   : > { %3344 = vxpose.xlu0.b32.cont [2/16] (narrow) %v3296_v61, 8  ;;  %3320 = vxpose.xlu1.b32.cont [10/16] (narrow) %v3288_v31, 8  ;;  %v3260_v51 = vadd.f32 %v3193_v17, %v2729_v9  ;;  %v3262_v61 = vadd.f32 %v4105_v38, %v2737_v52 }
 0x386   : > { %v4065_v10 = vpop.f32.mrf.mxu0  ;;  %v5826_v32 = vpop.f32.mrf.mxu1 }
 0x387   : > { %v2753_v54 = vadd.f32 %v4065_v10, %v5754_v23  ;;  %v3255_v10 = vadd.f32 %v5801_v18, %v2708_v53 }
 0x388   : > { %v2744_v19 = vpop.f32.mrf.mxu0  ;;  %v3196_v34 = vpop.f32.mrf.mxu1 }
 0x389   : > { %3345 = vxpose.xlu0.b32.cont [3/16] (narrow) %v3297_v25, 8  ;;  %3321 = vxpose.xlu1.b32.cont [11/16] (narrow) %v3289_v20, 8  ;;  %v2745_v48 = vadd.f32 %v2744_v19, %v5756_v58  ;;  %v3299_v58 = vadd.f32 %v5781_v42, %v3260_v51  ;;  %v3261_v29 = vadd.f32 %v3196_v34, %v2732_v35 }
 0x38a   : > { %v4066_v36 = vpop.f32.mrf.mxu0  ;;  %v4109_v63 = vpop.f32.mrf.mxu1  ;;  %v3263_v25 = vadd.f32 %v5826_v32, %v2740_v6  ;;  %v3294_v9 = vadd.f32 %v5781_v42, %v3255_v10 }
 0x38b   : > { %v3266_v5 = vadd.f32 %v4109_v63, %v2753_v54  ;;  %v2756_v39 = vadd.f32 %v4066_v36, %v5760_v49  ;;  %v2705_v49 = vadd.f32 %v5776_v26, %v5730_v46  ;;  %v3300_v17 = vadd.f32 %v5781_v42, %v3261_v29 }
 0x38c   : > { %v2747_v55 = vpop.f32.mrf.mxu0  ;;  %v3209_v23 = vpop.f32.mrf.mxu1  ;;  %v3302_v19 = vadd.f32 %v5781_v42, %v3263_v25 }
 0x38d   : > { %v3305_v62 = vadd.f32 %v5781_v42, %v3266_v5  ;;  %v3264_v12 = vadd.f32 %v3209_v23, %v2745_v48  ;;  %3346 = vxpose.xlu0.b32.cont [4/16] (narrow) %v3298_v4, 8  ;;  %3322 = vxpose.xlu1.b32.cont [12/16] (narrow) %v3290_v28, 8  ;;  %v2748_v11 = vadd.f32 %v2747_v55, %v5762_v30  ;;  %v4197_v48 = vmov 0.0  }
 0x38e   : > { %v4069_v7 = vpop.f32.mrf.mxu0  ;;  %v4110_v0 = vpop.f32.mrf.mxu1  ;;  %v3254_v33 = vadd.f32 %v5797_v22, %v2705_v49 }
 0x38f   : > { %v3303_v57 = vadd.f32 %v5781_v42, %v3264_v12  ;;  %v3267_v21 = vadd.f32 %v4110_v0, %v2756_v39  ;;  %v2769_v46 = vadd.f32 %v4069_v7, %v5764_v41  ;;  %v3301_v41 = vadd.f32 %v5781_v42, %v3262_v61 }
 0x390   : > { %v2760_v2 = vpop.f32.mrf.mxu0  ;;  %v3212_v27 = vpop.f32.mrf.mxu1  ;;  %v3293_v38 = vadd.f32 %v5781_v42, %v3254_v33  ;;  %v4198_v39 = vmov 1.0|1.0  }
 0x391   : > { %v3306_v47 = vadd.f32 %v5781_v42, %v3267_v21  ;;  %v3265_v31 = vadd.f32 %v3212_v27, %v2748_v11  ;;  %3347 = vxpose.xlu0.b32.cont [5/16] (narrow) %v3299_v58, 8  ;;  %3323 = vxpose.xlu1.b32.cont [13/16] (narrow) %v3291_v15, 8  ;;  %v2761_v43 = vadd.f32 %v2760_v2, %v5766_v14 }
 0x392   : > { %v4070_v30 = vpop.f32.mrf.mxu0  ;;  %v4113_v37 = vpop.f32.mrf.mxu1 }
 0x393   : > { %v3304_v26 = vadd.f32 %v5781_v42, %v3265_v31  ;;  %v3270_v22 = vadd.f32 %v4113_v37, %v2769_v46  ;;  %v2772_v13 = vadd.f32 %v4070_v30, %v5770_v56  ;;  %v3466_v31 = vld [vmem:[#allocation2] sm:$0x1] }
 0x394   : > { %v2763_v20 = vpop.f32.mrf.mxu0  ;;  %v3225_v3 = vpop.f32.mrf.mxu1 }
 0x395   : > { %3348 = vxpose.xlu0.b32.cont [6/16] (narrow) %v3300_v17, 8  ;;  %3324 = vxpose.xlu1.b32.cont [14/16] (narrow) %v3292_v1, 8  ;;  %v3309_v44 = vadd.f32 %v5781_v42, %v3270_v22  ;;  %v3268_v24 = vadd.f32 %v3225_v3, %v2761_v43  ;;  %v2764_v14 = vadd.f32 %v2763_v20, %v5772_v16 }
 0x396   : > { %v4114_v50 = vpop.f32.mrf.mxu1 }
 0x397   : > { %v3307_v8 = vadd.f32 %v5781_v42, %v3268_v24  ;;  %v3271_v60 = vadd.f32 %v4114_v50, %v2772_v13 }
 0x398   : > { %v3228_v18 = vpop.f32.mrf.mxu1 }
 0x399   : > { %3349 = vxpose.xlu0.b32.cont [7/16] (narrow) %v3301_v41, 8  ;;  %3325 = vxpose.xlu1.b32.cont [15/16] (narrow) %v3293_v38, 8  ;;  %v3310_v32 = vadd.f32 %v5781_v42, %v3271_v60  ;;  %v3269_v34 = vadd.f32 %v3228_v18, %v2764_v14 }
 0x39b   : > { %v3308_v56 = vadd.f32 %v5781_v42, %v3269_v34 }
 0x39d   : > { %3350 = vxpose.xlu0.b32.cont [8/16] (narrow) %v3302_v19, 8  ;;  %3326 = vxpose.xlu1.b32.end [16/16] (narrow) %v3294_v9, 8 }
 0x3a1   : > { %3351 = vxpose.xlu0.b32.cont [9/16] (narrow) %v3303_v57, 8  ;;  %v3456_v57 = vld [vmem:[%s5893_s5] sm:$0x3] }
 0x3a5   : > { %3352 = vxpose.xlu0.b32.cont [10/16] (narrow) %v3304_v26, 8 }
 0x3a9   : > { %3353 = vxpose.xlu0.b32.cont [11/16] (narrow) %v3305_v62, 8 }
 0x3ad   : > { %3354 = vxpose.xlu0.b32.cont [12/16] (narrow) %v3306_v47, 8 }
 0x3b1   : > { %3355 = vxpose.xlu0.b32.cont [13/16] (narrow) %v3307_v8, 8 }
 0x3b5   : > { %3356 = vxpose.xlu0.b32.cont [14/16] (narrow) %v3308_v56, 8 }
 0x3b9   : > { %3357 = vxpose.xlu0.b32.cont [15/16] (narrow) %v3309_v44, 8 }
 0x3bd   : > { %3358 = vxpose.xlu0.b32.end [16/16] (narrow) %v3310_v32, 8 }
 0x3dd   : > { %v3327_v16 = vpop.trf.xlu1 }
 0x3de   : > { %v3728_v54 = vmul.f32 -1.442695, %v3327_v16 }
 0x3e0   : > { %4170 = vpow2.f32 %v3728_v54 }
 0x3ed   : > { %v4171_v36 = vpop.eup %4170 }
 0x3ee   : > { %v3381_v63 = vadd.f32 1.0, %v4171_v36 }
 0x3fd   : > { %v3359_v59 = vpop.trf.xlu0 }
 0x3fe   : > { %v3729_v51 = vmul.f32 -1.442695, %v3359_v59 }
 0x400   : > { %4172 = vpow2.f32 %v3729_v51 }
 0x401   : > { %4174 = vrcp.f32 %v3381_v63 }
 0x40d   : > { %v4173_v42 = vpop.eup %4172 }
 0x40e   : > { %v3382_v28 = vadd.f32 1.0, %v4173_v42  ;;  %v4175_v4 = vpop.eup %4174 }
 0x40f   : > { %vm3399_vm13 = vcmp.gt.f32.partialorder %v4175_v4, 0.5 }
 0x410   : > { %4176 = vrcp.f32 %v3382_v28  ;;  %v3731_v5 = vsel %vm3399_vm13, 1.0, %v4197_v48  ;;  %vm3735_vm0 = vmpackc.low %vm3399_vm13, %vm3399_vm13 }
 0x411   : > { %v3448_v55 = vsel %vm3447_vm14, %v3731_v5, 0.0 }
 0x41d   : > { %v4177_v45 = vpop.eup %4176 }
 0x41e   : > { %v3389_v35 = vcombine.low %v4175_v4, %v4177_v45  ;;  %vm3400_vm15 = vcmp.gt.f32.partialorder %v4177_v45, 0.5 }
 0x41f   : > { %v3732_v23 = vsel %vm3400_vm15, 1.0, %v4197_v48  ;;  %vm3733_vm1 = vmpackc.low %vm3400_vm15, %vm3400_vm15 }
 0x420   : > { %3730 = vst.sshfl [vmem:[%s313_s24] sm:$0x33 pattern:$0x76325410] %v3389_v35  ;;  %3734 = vmatprep.mubr.msk.bf16.mxu0 %vm3733_vm1, %v4198_v39  ;;  %v3449_v62 = vsel %vm3447_vm14, %v3732_v23, 0.0 }
 0x421   : > { %3736 = vmatmul.mubr.msk.bf16.vlgmr.msra.gmra.mxu0 %vm3735_vm0, %v4198_v39  ;;  %v3450_v12 = vadd.f32 %v3449_v62, %v3448_v55 }
 0x423   : > { %3451 = vadd.xlane.f32.xlu0 %v3450_v12 }
 0x4ac   : > { %v3452_v15 = vpop.xlane.xlu0 %3451 }
 0x4ad   : > { %v3453_v40 = vmax.f32 %v3452_v15, 1.0 }
 0x4af   : > { %4178 = vrcp.f32 %v3453_v40 }
 0x4bc   : > { %v4179_v29 = vpop.eup %4178 }
 0x4e1   : > { %v3875_v58 = vpop.f32.mrf.mxu0 }
 0x4e3   : > { %v3876_v7 = vpop.f32.mrf.mxu0 }
 0x4e4   : > { %v3877_v0 = vadd.f32 %v3876_v7, %v3875_v58 }
 0x4e5   : > { %v3878_v11 = vpop.f32.mrf.mxu0 }
 0x4e6   : > { %v3455_v21 = vmul.f32 %v4179_v29, %v3877_v0 }
 0x4e7   : > { %v3879_v49 = vpop.f32.mrf.mxu0 }
 0x4e8   : > { %v3457_v52 = vmul.f32 %v3456_v57, %v3455_v21 }
 0x4ea   : > { %v3459_v2 = vsel %vm3458_vm2, %v3457_v52, 0.0 }
 0x4eb   : > { %3460 = vadd.xlane.f32.xlu1 %v3459_v2 }
 0x574   : > { %v3461_v27 = vpop.xlane.xlu1 %3460 }
 0x575   : > { %v3463_v47 = vrot.slane %v3461_v27, 1 }
 0x577   : > { %v3465_v33 = vadd.f32 %v3463_v47, %v3461_v27 }
 0x579   : > { %v3467_v61 = vadd.f32 %v3466_v31, %v3465_v33 }
 0x57b   : > { %v3737_v30 = vmul.f32 -1.442695, %v3467_v61 }
 0x57d   : > { %4180 = vpow2.f32 %v3737_v30 }
 0x58a   : > { %v4181_v1 = vpop.eup %4180 }
 0x58b   : > { %v3471_v17 = vadd.f32 1.0, %v4181_v1 }
 0x58d   : > { %4182 = vrcp.f32 %v3471_v17 }
 0x59a   : > { %v4183_v46 = vpop.eup %4182 }
 0x59b   : > { %3475 = vst.msk [vmem:[%s316_s6] sm:$0x1] %vm3474_vm3, %v4183_v46 }
 0x59c PF: > { %s21_s29 = sadd.s32 1, %s4190_s29  }
 0x59d   : > { %p18_p4 = scmp.ge.s32.totalorder %s21_s29, 4  }
 0x59f   :  { %20 = sbr.rel (!%p18_p4) target bundleno = 3 (0x3), region = 94 }

</bundles_post_ra>
